<compile_context>
chip_gen: v7x
topology: tpu7x:2x2x1
jax: 0.10.0
libtpu: 0.0.40
codegen_flags: <defaults>
</compile_context>

<pallas_src>
import functools

import jax
import jax.numpy as jnp
import numpy as np
from jax.experimental import pallas as pl
from jax.experimental.pallas import tpu as pltpu

# ---- stand-in hyper-parameter tables (shapes consistent with the module) ----
channel_list    = {'ucihar': [8, 16, 32, 64, 6]}        # 4 conv widths + num classes
conv_list       = {'ucihar': [(3, 1), (1, 1), (1, 0)]}  # kernel, stride, padding
maxp_list       = {'ucihar': [(2, 1)]}                  # MaxPool2d (stride = kernel)
first_maxp_list = {'ucihar': [(2, 1)]}

BN_EPS = 1e-5
KH = conv_list['ucihar'][0][0]          # 3 (conv kernel height)
N_CONV_LAYERS = 4


# --------------------------- packed-constant geometry --------------------------
def _pack_geometry(H, W):
    """Static layout of the single packed constants buffer (shared by init & kernel)."""
    assert H % 16 == 0, "four MaxPool(2,1) stages require H divisible by 16"
    chans = channel_list['ucihar']
    conv_chs = [1] + chans[:4]
    n_cls = chans[-1]
    c4 = conv_chs[4]
    h4 = H // 16                        # GetFeatureMapSize stand-in: 4x (same-pad conv + pool/2)
    hw4 = h4 * W
    J = hw4 * n_cls
    conv_offs, off = [], 0
    for l in range(N_CONV_LAYERS):      # column blocks: [w1 | w2 | w3 | w4 | vflat/mask | rmat]
        conv_offs.append(off)
        off += conv_chs[l + 1]
    offv = off
    off += J
    offr = off
    off += n_cls
    ncols = off
    bias_row = max(KH * conv_chs[3], c4 + hw4, J)   # tallest column block
    nrows = bias_row + 1
    return dict(conv_chs=conv_chs, n_cls=n_cls, c4=c4, h4=h4, hw4=hw4, J=J,
                conv_offs=conv_offs, offv=offv, offr=offr,
                bias_row=bias_row, nrows=nrows, ncols=ncols)


# ----------------------------- fused Pallas kernel ----------------------------
def _relu_pool_h(y2d, bw):
    """ReLU + MaxPool2d((2,1)) along H.  y2d: (Hl*bw, C) -> (Hl//2*bw, C).

    Rows are h-major (bw = W rows per h), so a tile-aligned regroup into
    (Hl//2, 2*bw, C) puts the two H rows of each pool window into sublane
    halves; one max, no scratch, no per-row stores.  Requires bw % 8 == 0.
    """
    y = jnp.maximum(y2d, 0.0)
    rows, c = y.shape
    y3 = y.reshape(rows // (2 * bw), 2 * bw, c)
    p = jnp.maximum(y3[:, :bw, :], y3[:, bw:, :])
    return p.reshape(rows // 2, c)


def conv4net_kernel(x_ref, pk_ref, out_ref, *, H, W):
    """One sample's full Conv4NetSup forward per grid step.

    Activation layout: 2-D (H_l*W, C) slabs with rows ordered (h, w) and
    channels in lanes.  The (3,1) conv only mixes H, so each conv layer is a
    single im2col MXU matmul: (rows, 3*Cin) @ (3*Cin, Cout).
    """
    g = _pack_geometry(H, W)
    conv_chs = g['conv_chs']
    n_cls = g['n_cls']
    br = g['bias_row']
    bw = W                                              # rows per H position

    # ---- layer 1 (Cin == 1): VPU broadcast multiply-accumulate, bias folded in ----
    x = x_ref[...]                                      # (H*W, 1), rows = h*W + w
    rows = H * W
    c1 = conv_chs[1]
    o1 = g['conv_offs'][0]
    w1 = pk_ref[0:KH, o1:o1 + c1]                       # (3, C1)
    b1 = pk_ref[br:br + 1, o1:o1 + c1]                  # (1, C1)
    z = jnp.zeros((bw, 1), jnp.float32)
    xp = jnp.concatenate([z, x, z], axis=0)             # conv padding (1, 0) along H
    y = (xp[0:rows] * w1[0:1]
         + xp[bw:bw + rows] * w1[1:2]
         + xp[2 * bw:2 * bw + rows] * w1[2:3]
         + b1)
    act = _relu_pool_h(y, bw)                           # (H//2*W, C1)

    # ---- layers 2..4: ONE im2col MXU matmul per layer (dense pre-flattened weights) ----
    for l in range(1, N_CONV_LAYERS):
        cin, cout = conv_chs[l], conv_chs[l + 1]
        off = g['conv_offs'][l]
        w = pk_ref[0:KH * cin, off:off + cout]          # (3*Cin, Cout)
        b = pk_ref[br:br + 1, off:off + cout]           # (1, Cout)
        rows = act.shape[0]
        z = jnp.zeros((bw, cin), jnp.float32)
        xp = jnp.concatenate([z, act, z], axis=0)       # pad H (one small sublane copy)
        slab = jnp.concatenate(                         # im2col: lane-concat of 3 H-shifted views
            [xp[0:rows], xp[bw:bw + rows], xp[2 * bw:2 * bw + rows]], axis=1)
        y = jnp.dot(slab, w, preferred_element_type=jnp.float32) + b
        act = _relu_pool_h(y, bw)

    # ---- classifier: NCHW flatten folded into a pre-permuted weight + mask + reductions ----
    # act: (hw4, C4) with row hw = h*W + w.
    #   q[hw, j=(hw')*n_cls+n] = act[hw, :] @ vflat[:, j]            (1 MXU matmul)
    #   masked so only j with hw' == hw survive, then sublane-sum over hw (XLU),
    #   and one tiny (1, J) @ (J, n_cls) matmul collapses hw' -> n.
    c4, hw4, J = g['c4'], g['hw4'], g['J']
    offv, offr = g['offv'], g['offr']
    vflat = pk_ref[0:c4, offv:offv + J]                 # (C4, J)
    msk = pk_ref[c4:c4 + hw4, offv:offv + J]            # (hw4, J) 0/1
    rmat = pk_ref[0:J, offr:offr + n_cls]               # (J, n_cls) 0/1
    bc = pk_ref[br:br + 1, offv:offv + n_cls]           # (1, n_cls)

    q = jnp.dot(act, vflat, preferred_element_type=jnp.float32)      # (hw4, J)
    l1 = jnp.sum(q * msk, axis=0, keepdims=True)                     # (1, J)
    logits = jnp.dot(l1, rmat, preferred_element_type=jnp.float32) + bc
    out_ref[0, :, :] = logits                                        # (1, n_cls)


# ------------------------------ parameter glue --------------------------------
def fold_bn(conv_w, conv_b, gamma, beta, mean, var):
    """Fold eval-mode BatchNorm2d into the conv. conv_w: (Cout, Cin, KH, 1)."""
    scale = gamma / jnp.sqrt(var + BN_EPS)                 # (Cout,)
    w = conv_w[..., 0] * scale[:, None, None]              # (Cout, Cin, KH)
    b = (conv_b - mean) * scale + beta                     # (Cout,)
    return jnp.transpose(w, (2, 1, 0)), b                  # (KH, Cin, Cout), (Cout,)


def init_params(key, *, H, W):
    """Build BN-folded weights and pack ALL kernel constants into one f32 buffer."""
    g = _pack_geometry(H, W)
    conv_chs, n_cls, br = g['conv_chs'], g['n_cls'], g['bias_row']
    pk = np.zeros((g['nrows'], g['ncols']), np.float32)
    dense_ref = []                       # kept only for the pure-JAX reference check
    for l in range(N_CONV_LAYERS):
        cin, cout = conv_chs[l], conv_chs[l + 1]
        key, k1, k2, k3, k4, k5, k6 = jax.random.split(key, 7)
        conv_w = 0.1 * jax.random.normal(k1, (cout, cin, KH, 1), jnp.float32)
        conv_b = 0.1 * jax.random.normal(k2, (cout,), jnp.float32)
        gamma  = 1.0 + 0.1 * jax.random.normal(k3, (cout,), jnp.float32)
        beta   = 0.1 * jax.random.normal(k4, (cout,), jnp.float32)
        mean   = 0.1 * jax.random.normal(k5, (cout,), jnp.float32)
        var    = jnp.abs(1.0 + 0.1 * jax.random.normal(k6, (cout,), jnp.float32))
        w_kio, b_o = fold_bn(conv_w, conv_b, gamma, beta, mean, var)   # (KH,Cin,Cout),(Cout,)
        off = g['conv_offs'][l]
        pk[0:KH * cin, off:off + cout] = np.asarray(w_kio).reshape(KH * cin, cout)
        pk[br, off:off + cout] = np.asarray(b_o)
        dense_ref.append((w_kio, b_o))

    c4, h4, hw4, J = g['c4'], g['h4'], g['hw4'], g['J']
    feat = c4 * h4 * W                                     # use_adativeavg=False
    key, kw, kb = jax.random.split(key, 3)
    wc = 0.05 * jax.random.normal(kw, (n_cls, feat), jnp.float32)  # PyTorch (out, in)
    bc = 0.05 * jax.random.normal(kb, (n_cls,), jnp.float32)

    # Pre-permute the classifier weight to the kernel's (h, w) row / channel-lane
    # layout and build the constant mask / reduction matrix for the NCHW flatten.
    wc4 = np.asarray(wc).reshape(n_cls, c4, h4, W)                     # [n, c, h, w]
    vflat = np.transpose(wc4, (1, 2, 3, 0)).reshape(c4, J)             # (C4, J)
    mask = (np.arange(hw4)[:, None] == (np.arange(J)[None, :] // n_cls)).astype(np.float32)
    rmat = (np.arange(J)[:, None] % n_cls == np.arange(n_cls)[None, :]).astype(np.float32)

    offv, offr = g['offv'], g['offr']
    pk[0:c4, offv:offv + J] = vflat
    pk[c4:c4 + hw4, offv:offv + J] = mask
    pk[br, offv:offv + n_cls] = np.asarray(bc)
    pk[0:J, offr:offr + n_cls] = rmat

    params = {'pk': jnp.asarray(pk)}
    aux = {'dense': dense_ref, 'wc': wc, 'bc': bc}
    return params, aux


# --------------------------------- forward -------------------------------------
def conv4netsup_forward(x_nchw, params):
    """x_nchw: (B, 1, H, W) float32 (PyTorch NCHW).  Returns {'output': (B, n_cls)}."""
    B, Cin, H, W = x_nchw.shape
    assert Cin == 1                     # layer1 of the module always has in_channels=1
    assert H % 16 == 0                  # four MaxPool(2,1) stages along H
    # TODO(synk): W must be a multiple of 8 for the sublane-aligned pool reshape;
    # general W (e.g. ucihar's 9 sensors) would need a padded-W variant.
    assert W % 8 == 0
    g = _pack_geometry(H, W)
    n_cls = g['n_cls']

    # dataset == 'ucihar' -> the F.pad replicate branch for 'uschad' is not taken.
    # Free, contiguous reshape (no copy): rows ordered (b, h, w), channel in lanes.
    x_flat = x_nchw.reshape(B * H * W, 1)

    out3 = pl.pallas_call(
        functools.partial(conv4net_kernel, H=H, W=W),
        out_shape=jax.ShapeDtypeStruct((B, 1, n_cls), jnp.float32),
        grid=(B,),
        in_specs=[
            pl.BlockSpec((H * W, 1), lambda b: (b, 0)),                # one sample's column
            pl.BlockSpec((g['nrows'], g['ncols']), lambda b: (0, 0)),  # packed constants (resident)
        ],
        out_specs=pl.BlockSpec((1, 1, n_cls), lambda b: (b, 0, 0)),
        compiler_params=pltpu.CompilerParams(
            dimension_semantics=("parallel",),          # v7x megacore: samples across TCs
            vmem_limit_bytes=4 * 1024 * 1024),
    )(x_flat, params['pk'])
    # TODO(synk): BatchNorm implemented in eval mode (running stats folded into conv);
    # training-mode batch statistics are not reproduced.
    return {'output': out3.reshape(B, n_cls)}


# ----------------------- pure-JAX reference (for checking) ---------------------
def reference_forward(x_nchw, aux):
    """NCHW reference using the same BN-folded weights (plain XLA ops)."""
    a = x_nchw.astype(jnp.float32)
    for w_kio, b_o in aux['dense']:                        # w: (KH, Cin, Cout)
        Bq, _, Hq, Wq = a.shape
        ap = jnp.pad(a, ((0, 0), (0, 0), (1, 1), (0, 0)))  # conv padding (1, 0)
        y = jnp.zeros((Bq, w_kio.shape[2], Hq, Wq), jnp.float32)
        for kh in range(KH):
            y = y + jnp.einsum('bihw,io->bohw', ap[:, :, kh:kh + Hq, :], w_kio[kh])
        y = jnp.maximum(y + b_o[None, :, None, None], 0.0)
        a = jnp.maximum(y[:, :, 0::2, :], y[:, :, 1::2, :])   # MaxPool2d((2, 1))
    feats = a.reshape(a.shape[0], -1)                         # x.view(B, -1), NCHW order
    return feats @ aux['wc'].T + aux['bc']


if __name__ == "__main__":
    key = jax.random.PRNGKey(0)
    B, Cin, H, W = 2, 1, 32, 8          # small ucihar-like input: 1 channel, 32 steps, 8 sensors
    kx, kp = jax.random.split(key)
    x = jax.random.normal(kx, (B, Cin, H, W), dtype=jnp.float32)
    params, aux = init_params(kp, H=H, W=W)

    fwd = jax.jit(conv4netsup_forward)
    out = jax.block_until_ready(fwd(x, params)['output'])
    assert out.shape == (B, channel_list['ucihar'][-1]), out.shape
    assert bool(jnp.all(jnp.isfinite(out)))

    # numerical check against a pure-JAX NCHW reference using the same folded params
    ref = jax.block_until_ready(reference_forward(x, aux))
    err = float(jnp.max(jnp.abs(out - ref)))
    tol = 1e-4 * (1.0 + float(jnp.max(jnp.abs(ref))))
    assert err <= tol, (err, tol)

    print("KERNEL_OK")
</pallas_src>

<mosaic_0001>
module attributes {stable_mosaic.version = 11 : i64} {
  func.func @conv4net_kernel(%arg0: i32, %arg1: memref<256x1xf32, #tpu.memory_space<vmem>>, %arg2: memref<97x222xf32, #tpu.memory_space<vmem>>, %arg3: memref<1x1x6xf32, #tpu.memory_space<vmem>>) attributes {dimension_semantics = [#tpu.dimension_semantics<parallel>], iteration_bounds = array<i64: 2>, scalar_prefetch = 0 : i64, scratch_operands = 0 : i64, tpu.core_type = #tpu.core_type<tc>, window_params = [{transform_indices = @transform_0, window_bounds = array<i64: 256, 1>}, {pipeline_mode = #tpu.pipeline_mode<synchronous>, transform_indices = @transform_1, window_bounds = array<i64: 97, 222>}, {transform_indices = @transform_2, window_bounds = array<i64: 1, 1, 6>}]} {
    %c0 = arith.constant 0 : index
    %c0_0 = arith.constant 0 : index
    %0 = vector.load %arg1[%c0, %c0_0] : memref<256x1xf32, #tpu.memory_space<vmem>>, vector<256x1xf32>
    %c0_1 = arith.constant 0 : index
    %c0_2 = arith.constant 0 : index
    %1 = vector.load %arg2[%c0_1, %c0_2] : memref<97x222xf32, #tpu.memory_space<vmem>>, vector<3x8xf32>
    %c96 = arith.constant 96 : index
    %c0_3 = arith.constant 0 : index
    %2 = vector.load %arg2[%c96, %c0_3] : memref<97x222xf32, #tpu.memory_space<vmem>>, vector<1x8xf32>
    %cst = arith.constant 0.000000e+00 : f32
    %3 = vector.broadcast %cst : f32 to vector<8x1xf32>
    %4 = tpu.concatenate %3, %0, %3 in 0 : vector<8x1xf32>, vector<256x1xf32>, vector<8x1xf32> -> vector<272x1xf32>
    %5 = vector.extract_strided_slice %4 {offsets = [0, 0], sizes = [256, 1], strides = [1, 1]} : vector<272x1xf32> to vector<256x1xf32>
    %6 = vector.extract_strided_slice %1 {offsets = [0, 0], sizes = [1, 8], strides = [1, 1]} : vector<3x8xf32> to vector<1x8xf32>
    %7 = vector.broadcast %5 : vector<256x1xf32> to vector<256x8xf32>
    %8 = vector.broadcast %6 : vector<1x8xf32> to vector<256x8xf32>
    %9 = arith.mulf %7, %8 : vector<256x8xf32>
    %10 = vector.extract_strided_slice %4 {offsets = [8, 0], sizes = [256, 1], strides = [1, 1]} : vector<272x1xf32> to vector<256x1xf32>
    %11 = vector.extract_strided_slice %1 {offsets = [1, 0], sizes = [1, 8], strides = [1, 1]} : vector<3x8xf32> to vector<1x8xf32>
    %12 = vector.broadcast %10 : vector<256x1xf32> to vector<256x8xf32>
    %13 = vector.broadcast %11 : vector<1x8xf32> to vector<256x8xf32>
    %14 = arith.mulf %12, %13 : vector<256x8xf32>
    %15 = arith.addf %9, %14 : vector<256x8xf32>
    %16 = vector.extract_strided_slice %4 {offsets = [16, 0], sizes = [256, 1], strides = [1, 1]} : vector<272x1xf32> to vector<256x1xf32>
    %17 = vector.extract_strided_slice %1 {offsets = [2, 0], sizes = [1, 8], strides = [1, 1]} : vector<3x8xf32> to vector<1x8xf32>
    %18 = vector.broadcast %16 : vector<256x1xf32> to vector<256x8xf32>
    %19 = vector.broadcast %17 : vector<1x8xf32> to vector<256x8xf32>
    %20 = arith.mulf %18, %19 : vector<256x8xf32>
    %21 = arith.addf %15, %20 : vector<256x8xf32>
    %22 = vector.broadcast %2 : vector<1x8xf32> to vector<256x8xf32>
    %23 = arith.addf %21, %22 : vector<256x8xf32>
    %cst_4 = arith.constant 0.000000e+00 : f32
    %24 = vector.broadcast %cst_4 : f32 to vector<256x8xf32>
    %25 = arith.maximumf %23, %24 : vector<256x8xf32>
    %26 = vector.shape_cast %25 : vector<256x8xf32> to vector<16x16x8xf32>
    %27 = vector.extract_strided_slice %26 {offsets = [0, 0, 0], sizes = [16, 8, 8], strides = [1, 1, 1]} : vector<16x16x8xf32> to vector<16x8x8xf32>
    %28 = vector.extract_strided_slice %26 {offsets = [0, 8, 0], sizes = [16, 8, 8], strides = [1, 1, 1]} : vector<16x16x8xf32> to vector<16x8x8xf32>
    %29 = arith.maximumf %27, %28 : vector<16x8x8xf32>
    %30 = vector.shape_cast %29 : vector<16x8x8xf32> to vector<128x8xf32>
    %c0_5 = arith.constant 0 : index
    %c8 = arith.constant 8 : index
    %31 = vector.load %arg2[%c0_5, %c8] : memref<97x222xf32, #tpu.memory_space<vmem>>, vector<24x16xf32>
    %c96_6 = arith.constant 96 : index
    %c8_7 = arith.constant 8 : index
    %32 = vector.load %arg2[%c96_6, %c8_7] : memref<97x222xf32, #tpu.memory_space<vmem>>, vector<1x16xf32>
    %cst_8 = arith.constant 0.000000e+00 : f32
    %33 = vector.broadcast %cst_8 : f32 to vector<8x8xf32>
    %34 = tpu.concatenate %33, %30, %33 in 0 : vector<8x8xf32>, vector<128x8xf32>, vector<8x8xf32> -> vector<144x8xf32>
    %35 = vector.extract_strided_slice %34 {offsets = [0, 0], sizes = [128, 8], strides = [1, 1]} : vector<144x8xf32> to vector<128x8xf32>
    %36 = vector.extract_strided_slice %34 {offsets = [8, 0], sizes = [128, 8], strides = [1, 1]} : vector<144x8xf32> to vector<128x8xf32>
    %37 = vector.extract_strided_slice %34 {offsets = [16, 0], sizes = [128, 8], strides = [1, 1]} : vector<144x8xf32> to vector<128x8xf32>
    %38 = tpu.concatenate %35, %36, %37 in 1 : vector<128x8xf32>, vector<128x8xf32>, vector<128x8xf32> -> vector<128x24xf32>
    %cst_9 = arith.constant dense<0.000000e+00> : vector<128x16xf32>
    %39 = tpu.matmul %38, %31, %cst_9 {dimension_numbers = #tpu.dot_dimension_numbers<[1], [0], [0], [1], [0, 0, 1, 1], [], []>} : vector<128x24xf32>, vector<24x16xf32>, vector<128x16xf32> -> vector<128x16xf32>
    %40 = vector.broadcast %32 : vector<1x16xf32> to vector<128x16xf32>
    %41 = arith.addf %39, %40 : vector<128x16xf32>
    %cst_10 = arith.constant 0.000000e+00 : f32
    %42 = vector.broadcast %cst_10 : f32 to vector<128x16xf32>
    %43 = arith.maximumf %41, %42 : vector<128x16xf32>
    %44 = vector.shape_cast %43 : vector<128x16xf32> to vector<8x16x16xf32>
    %45 = vector.extract_strided_slice %44 {offsets = [0, 0, 0], sizes = [8, 8, 16], strides = [1, 1, 1]} : vector<8x16x16xf32> to vector<8x8x16xf32>
    %46 = vector.extract_strided_slice %44 {offsets = [0, 8, 0], sizes = [8, 8, 16], strides = [1, 1, 1]} : vector<8x16x16xf32> to vector<8x8x16xf32>
    %47 = arith.maximumf %45, %46 : vector<8x8x16xf32>
    %48 = vector.shape_cast %47 : vector<8x8x16xf32> to vector<64x16xf32>
    %c0_11 = arith.constant 0 : index
    %c24 = arith.constant 24 : index
    %49 = vector.load %arg2[%c0_11, %c24] : memref<97x222xf32, #tpu.memory_space<vmem>>, vector<48x32xf32>
    %c96_12 = arith.constant 96 : index
    %c24_13 = arith.constant 24 : index
    %50 = vector.load %arg2[%c96_12, %c24_13] : memref<97x222xf32, #tpu.memory_space<vmem>>, vector<1x32xf32>
    %cst_14 = arith.constant 0.000000e+00 : f32
    %51 = vector.broadcast %cst_14 : f32 to vector<8x16xf32>
    %52 = tpu.concatenate %51, %48, %51 in 0 : vector<8x16xf32>, vector<64x16xf32>, vector<8x16xf32> -> vector<80x16xf32>
    %53 = vector.extract_strided_slice %52 {offsets = [0, 0], sizes = [64, 16], strides = [1, 1]} : vector<80x16xf32> to vector<64x16xf32>
    %54 = vector.extract_strided_slice %52 {offsets = [8, 0], sizes = [64, 16], strides = [1, 1]} : vector<80x16xf32> to vector<64x16xf32>
    %55 = vector.extract_strided_slice %52 {offsets = [16, 0], sizes = [64, 16], strides = [1, 1]} : vector<80x16xf32> to vector<64x16xf32>
    %56 = tpu.concatenate %53, %54, %55 in 1 : vector<64x16xf32>, vector<64x16xf32>, vector<64x16xf32> -> vector<64x48xf32>
    %cst_15 = arith.constant dense<0.000000e+00> : vector<64x32xf32>
    %57 = tpu.matmul %56, %49, %cst_15 {dimension_numbers = #tpu.dot_dimension_numbers<[1], [0], [0], [1], [0, 0, 1, 1], [], []>} : vector<64x48xf32>, vector<48x32xf32>, vector<64x32xf32> -> vector<64x32xf32>
    %58 = vector.broadcast %50 : vector<1x32xf32> to vector<64x32xf32>
    %59 = arith.addf %57, %58 : vector<64x32xf32>
    %cst_16 = arith.constant 0.000000e+00 : f32
    %60 = vector.broadcast %cst_16 : f32 to vector<64x32xf32>
    %61 = arith.maximumf %59, %60 : vector<64x32xf32>
    %62 = vector.shape_cast %61 : vector<64x32xf32> to vector<4x16x32xf32>
    %63 = vector.extract_strided_slice %62 {offsets = [0, 0, 0], sizes = [4, 8, 32], strides = [1, 1, 1]} : vector<4x16x32xf32> to vector<4x8x32xf32>
    %64 = vector.extract_strided_slice %62 {offsets = [0, 8, 0], sizes = [4, 8, 32], strides = [1, 1, 1]} : vector<4x16x32xf32> to vector<4x8x32xf32>
    %65 = arith.maximumf %63, %64 : vector<4x8x32xf32>
    %66 = vector.shape_cast %65 : vector<4x8x32xf32> to vector<32x32xf32>
    %c0_17 = arith.constant 0 : index
    %c56 = arith.constant 56 : index
    %67 = vector.load %arg2[%c0_17, %c56] : memref<97x222xf32, #tpu.memory_space<vmem>>, vector<96x64xf32>
    %c96_18 = arith.constant 96 : index
    %c56_19 = arith.constant 56 : index
    %68 = vector.load %arg2[%c96_18, %c56_19] : memref<97x222xf32, #tpu.memory_space<vmem>>, vector<1x64xf32>
    %cst_20 = arith.constant 0.000000e+00 : f32
    %69 = vector.broadcast %cst_20 : f32 to vector<8x32xf32>
    %70 = tpu.concatenate %69, %66, %69 in 0 : vector<8x32xf32>, vector<32x32xf32>, vector<8x32xf32> -> vector<48x32xf32>
    %71 = vector.extract_strided_slice %70 {offsets = [0, 0], sizes = [32, 32], strides = [1, 1]} : vector<48x32xf32> to vector<32x32xf32>
    %72 = vector.extract_strided_slice %70 {offsets = [8, 0], sizes = [32, 32], strides = [1, 1]} : vector<48x32xf32> to vector<32x32xf32>
    %73 = vector.extract_strided_slice %70 {offsets = [16, 0], sizes = [32, 32], strides = [1, 1]} : vector<48x32xf32> to vector<32x32xf32>
    %74 = tpu.concatenate %71, %72, %73 in 1 : vector<32x32xf32>, vector<32x32xf32>, vector<32x32xf32> -> vector<32x96xf32>
    %cst_21 = arith.constant dense<0.000000e+00> : vector<32x64xf32>
    %75 = tpu.matmul %74, %67, %cst_21 {dimension_numbers = #tpu.dot_dimension_numbers<[1], [0], [0], [1], [0, 0, 1, 1], [], []>} : vector<32x96xf32>, vector<96x64xf32>, vector<32x64xf32> -> vector<32x64xf32>
    %76 = vector.broadcast %68 : vector<1x64xf32> to vector<32x64xf32>
    %77 = arith.addf %75, %76 : vector<32x64xf32>
    %cst_22 = arith.constant 0.000000e+00 : f32
    %78 = vector.broadcast %cst_22 : f32 to vector<32x64xf32>
    %79 = arith.maximumf %77, %78 : vector<32x64xf32>
    %80 = vector.shape_cast %79 : vector<32x64xf32> to vector<2x16x64xf32>
    %81 = vector.extract_strided_slice %80 {offsets = [0, 0, 0], sizes = [2, 8, 64], strides = [1, 1, 1]} : vector<2x16x64xf32> to vector<2x8x64xf32>
    %82 = vector.extract_strided_slice %80 {offsets = [0, 8, 0], sizes = [2, 8, 64], strides = [1, 1, 1]} : vector<2x16x64xf32> to vector<2x8x64xf32>
    %83 = arith.maximumf %81, %82 : vector<2x8x64xf32>
    %84 = vector.shape_cast %83 : vector<2x8x64xf32> to vector<16x64xf32>
    %c0_23 = arith.constant 0 : index
    %c120 = arith.constant 120 : index
    %85 = vector.load %arg2[%c0_23, %c120] : memref<97x222xf32, #tpu.memory_space<vmem>>, vector<64x96xf32>
    %c64 = arith.constant 64 : index
    %c120_24 = arith.constant 120 : index
    %86 = vector.load %arg2[%c64, %c120_24] : memref<97x222xf32, #tpu.memory_space<vmem>>, vector<16x96xf32>
    %c0_25 = arith.constant 0 : index
    %c216 = arith.constant 216 : index
    %87 = vector.load %arg2[%c0_25, %c216] : memref<97x222xf32, #tpu.memory_space<vmem>>, vector<96x6xf32>
    %c96_26 = arith.constant 96 : index
    %c120_27 = arith.constant 120 : index
    %88 = vector.load %arg2[%c96_26, %c120_27] : memref<97x222xf32, #tpu.memory_space<vmem>>, vector<1x6xf32>
    %cst_28 = arith.constant dense<0.000000e+00> : vector<16x96xf32>
    %89 = tpu.matmul %84, %85, %cst_28 {dimension_numbers = #tpu.dot_dimension_numbers<[1], [0], [0], [1], [0, 0, 1, 1], [], []>} : vector<16x64xf32>, vector<64x96xf32>, vector<16x96xf32> -> vector<16x96xf32>
    %90 = arith.mulf %89, %86 : vector<16x96xf32>
    %cst_29 = arith.constant dense<0.000000e+00> : vector<96xf32>
    %91 = vector.multi_reduction <add>, %90, %cst_29 [0] : vector<16x96xf32> to vector<96xf32>
    %92 = vector.shape_cast %91 : vector<96xf32> to vector<1x96xf32>
    %cst_30 = arith.constant dense<0.000000e+00> : vector<1x6xf32>
    %93 = tpu.matmul %92, %87, %cst_30 {dimension_numbers = #tpu.dot_dimension_numbers<[1], [0], [0], [1], [0, 0, 1, 1], [], []>} : vector<1x96xf32>, vector<96x6xf32>, vector<1x6xf32> -> vector<1x6xf32>
    %94 = arith.addf %93, %88 : vector<1x6xf32>
    %c0_31 = arith.constant 0 : index
    %c0_32 = arith.constant 0 : index
    %c0_33 = arith.constant 0 : index
    %95 = vector.load %arg3[%c0_31, %c0_32, %c0_33] : memref<1x1x6xf32, #tpu.memory_space<vmem>>, vector<1x1x6xf32>
    %96 = vector.shape_cast %95 : vector<1x1x6xf32> to vector<1x6xf32>
    %97 = vector.shape_cast %94 : vector<1x6xf32> to vector<1x1x6xf32>
    tpu.vector_store %arg3[%c0_31, %c0_32, %c0_33], %97 {strides = array<i32>} : memref<1x1x6xf32, #tpu.memory_space<vmem>>, vector<1x1x6xf32>,
    return
  }
  func.func @transform_0(%arg0: i32) -> (i32, i32) {
    %c0_i32 = arith.constant 0 : i32
    %c0_i32_0 = arith.constant 0 : i32
    return %arg0, %c0_i32 : i32, i32
  }
  func.func @transform_1(%arg0: i32) -> (i32, i32) {
    %c0_i32 = arith.constant 0 : i32
    %c0_i32_0 = arith.constant 0 : i32
    %c0_i32_1 = arith.constant 0 : i32
    return %c0_i32, %c0_i32_0 : i32, i32
  }
  func.func @transform_2(%arg0: i32) -> (i32, i32, i32) {
    %c0_i32 = arith.constant 0 : i32
    %c0_i32_0 = arith.constant 0 : i32
    %c0_i32_1 = arith.constant 0 : i32
    return %arg0, %c0_i32, %c0_i32_0 : i32, i32, i32
  }
}

</mosaic_0001>

<bundles_post_ra>
// kernel: conv4netsup_forward.1
= control target key start
LH: loop header
LB: loop body
LE: loop exit
PB: predicated region body
PF: predicated region fallthrough
CT: control target
= control target key end

     0   :  { %7 = vsyncpa [#allocation3], 0  ;;  %s3173_s0 = inlined_call_operand.vmem [shape: f32[512,1], index: 0, kind: input, shape index: {}]   ;;  %s3174_s1 = inlined_call_operand.vmem [shape: f32[97,222], index: 1, kind: input, shape index: {}]   ;;  %s3175_s2 = inlined_call_operand.hbm [shape: f32[2,1,6], index: 2, kind: output, shape index: {}]  }
   0x1   :  { %9 = vsyncpa [#allocation3 + $0x1], 0  ;;  %s2389_s9 = smov 0   ;;  %s2391_s10 = smov 0  }
   0x2   :  { %s2393_s11 = smov 0   ;;  %s2395_s12 = smov 0  }
   0x3 LB: > { %s2410_s13 = sadd.s32 4294967295, %s2359_s12   ;;  %s1807_s14 = sadd.s32 4294967294, %s2359_s12   ;;  %s2359_s12 = sphi %s2395_s12, %s3181_s12   ;;  %s2355_s11 = sphi %s2393_s11, %s3180_s11   ;;  %s2351_s10 = sphi %s2391_s10, %s3179_s10   ;;  %s2347_s9 = sphi %s2389_s9, %s3178_s9  }
   0x4   : > { %s2414_s15 = sadd.s32 1, %s2359_s12   ;;  %s69_s16 = sadd.s32 1, %s2355_s11 }
   0x5   : > { %s66_s17 = ssub.s32 %s2359_s12, %s2414_s15  ;;  %p79_p0 = scmp.ne.s32.totalorder %s2355_s11, %s2351_s10 }
   0x6   : > { %p67_p1 = scmp.eq.s32.totalorder %s66_s17, 0  ;;  %p80_p2 = scmp.eq.s32.totalorder %s2410_s13, 1 }
   0x7   : > { %p85_p3 = scmp.ne.s32.totalorder %s2351_s10, %s2347_s9  ;;  %p86_p4 = scmp.eq.s32.totalorder %s1807_s14, 1 }
   0x8   : > { %s2425_s18 = scalar_select %p67_p1, %s2355_s11, %s69_s16  }
   0x9   : > { %p2427_p5 = por %p80_p2, %p79_p0  ;;  %p2431_p6 = por %p86_p4, %p85_p3 }
   0xa   : > { %p1810_p7 = scmp.ge.s32.totalorder %s2359_s12, 1  ;;  %p116_p8 = scmp.lt.s32.totalorder %s2359_s12, 3 }
   0xc   : > { %p117_p9 = pnand %p1810_p7, %p116_p8 }
   0xd   : > { %s1811_s21 = sshll.u32 (!%p117_p9), %s2410_s13, 5  ;;  %v2361_v0 = vmov (!%p117_p9), 0   ;;  %v594_v33 = vld [vmem:[%s3174_s1] sm:$0xff] (!%p117_p9)  ;;  %v595_v34 = vld [vmem:[%s3174_s1 + $0x10] sm:$0xff] (!%p117_p9)  ;;  %s2362_s30 = smov (!%p117_p9), 120   ;;  %v337_v37 = vlaneseq (!%p117_p9)  ;;  %vm709_vm0 = vcmask (!%p117_p9), 64512  }
   0xe   : > { %120 = sbr.rel (%p117_p9) target bundleno = 1705 (0x6a9), region = 28  ;;  %2175 = vset.pattern.permute.xlu1 (!%p117_p9), %v2361_v0  ;;  %2174 = vset.pattern.permute.xlu0 (!%p117_p9), %v2361_v0  ;;  %p138_p10 = scmp.lt.s32.totalorder (!%p117_p9), %s1811_s21, 63  ;;  %v2481_v35 = vpack.i.bf16 (!%p117_p9), %v595_v34, %v594_v33  ;;  %v2488_v36 = vld [vmem:[%s3174_s1 + $0x20] sm:$0xff] (!%p117_p9)  ;;  %vm726_vm1 = vcmask (!%p117_p9), 130048   ;;  %vm759_vm2 = vcmask (!%p117_p9), 195584   ;;  %vm1047_vm3 = vcmask (!%p117_p9), 261120  }
   0xf   : > { %v338_v38 = vshrl.u32 (!%p117_p9), %v337_v37, 7  ;;  %v175_v41 = vld [vmem:[%s3174_s1] sm:$0x7] (!%p117_p9)  ;;  %s2363_s14 = smov (!%p117_p9), 8   ;;  %s2364_s16 = smov (!%p117_p9), 16   ;;  %vm1083_vm4 = vcmask (!%p117_p9), 392192  }
  0x10   : > { %v2513_v61 = vld [vmem:[%s3174_s1 + $0xc0] ss:$0 sm:$0xff] (!%p117_p9)  ;;  %s2367_s27 = smov (!%p117_p9), 32   ;;  %s2368_s4 = smov (!%p117_p9), 72   ;;  %vm1269_vm5 = vcmask (!%p117_p9), 523264   ;;  %vm1325_vm6 = vcmask (!%p117_p9), 785408  }
  0x11   : > { %v339_v39 = vsub.s32 (!%p117_p9), 0, %v338_v38  ;;  %v380_v40 = vsub.s32 (!%p117_p9), 1, %v338_v38  ;;  %v448_v44 = vsub.s32 (!%p117_p9), 2, %v338_v38  ;;  %vm2372_vm7 = vmmov (!%p117_p9), 0  }
  0x12   : > { %vm1737_vm8 = vcmask (!%p117_p9), 40960  }
  0x13   : > { %v2495_v42 = vrot.slane (!%p117_p9), %v175_v41, %v339_v39  ;;  %v2497_v43 = vrot.slane (!%p117_p9), %v175_v41, %v380_v40  ;;  %v2499_v47 = vrot.slane (!%p117_p9), %v175_v41, %v448_v44 }
  0x15   : > { %s3183_s21 = smov (!%p138_p10, %s1811_s21), 63  ;;  %v341_v48 = vmul.f32 0.0, %v2495_v42 }
  0x16   : > { %s1812_s22 = sshll.u32 %s3183_s21, 3 }
  0x17   : > { %s2441_s25 = scalar_lea.vmem %s3173_s0, %s1812_s22  ;;  %s2366_s22 = smov 104  }
  0x18   : > { %v145_v1 = vld [vmem:[%s2441_s25 + $0x10] sm:$0xff]  ;;  %v143_v2 = vld [vmem:[%s2441_s25] sm:$0xff]  ;;  %v146_v3 = vld [vmem:[%s2441_s25 + $0x18] sm:$0xff] }
  0x19   : > { %194 = vperm.xlu1 %2175, %v145_v1   ;;  %184 = vperm.xlu0 %2174, %v143_v2   ;;  %v144_v4 = vld [vmem:[%s2441_s25 + $0x8] sm:$0xff]  ;;  %v147_v6 = vld [vmem:[%s2441_s25 + $0x20] sm:$0xff]  ;;  %v150_v7 = vld [vmem:[%s2441_s25 + $0x38] sm:$0xff] }
  0x1a   : > { %v148_v5 = vld [vmem:[%s2441_s25 + $0x28] sm:$0xff]  ;;  %v149_v8 = vld [vmem:[%s2441_s25 + $0x30] sm:$0xff]  ;;  %v151_v10 = vld [vmem:[%s2441_s25 + $0x40] sm:$0xff] }
  0x1b   : > { %v152_v9 = vld [vmem:[%s2441_s25 + $0x48] sm:$0xff]  ;;  %v154_v11 = vld [vmem:[%s2441_s25 + $0x58] sm:$0xff]  ;;  %v153_v12 = vld [vmem:[%s2441_s25 + $0x50] sm:$0xff] }
  0x1c   : > { %v156_v13 = vld [vmem:[%s2441_s25 + $0x68] sm:$0xff]  ;;  %v155_v14 = vld [vmem:[%s2441_s25 + $0x60] sm:$0xff]  ;;  %v158_v15 = vld [vmem:[%s2441_s25 + $0x78] sm:$0xff] }
  0x1d   : > { %199 = vperm.xlu1 %2175, %v146_v3   ;;  %189 = vperm.xlu0 %2174, %v144_v4   ;;  %v157_v16 = vld [vmem:[%s2441_s25 + $0x70] sm:$0xff]  ;;  %v160_v17 = vld [vmem:[%s2441_s25 + $0x88] sm:$0xff]  ;;  %v159_v18 = vld [vmem:[%s2441_s25 + $0x80] sm:$0xff] }
  0x1e   : > { %v162_v19 = vld [vmem:[%s2441_s25 + $0x98] sm:$0xff]  ;;  %v161_v20 = vld [vmem:[%s2441_s25 + $0x90] sm:$0xff]  ;;  %v164_v21 = vld [vmem:[%s2441_s25 + $0xa8] sm:$0xff] }
  0x1f   : > { %v163_v22 = vld [vmem:[%s2441_s25 + $0xa0] sm:$0xff]  ;;  %v166_v23 = vld [vmem:[%s2441_s25 + $0xb8] sm:$0xff]  ;;  %v165_v24 = vld [vmem:[%s2441_s25 + $0xb0] sm:$0xff] }
  0x20   : > { %v168_v25 = vld [vmem:[%s2441_s25 + $0xc8] sm:$0xff]  ;;  %v167_v26 = vld [vmem:[%s2441_s25 + $0xc0] sm:$0xff]  ;;  %v170_v27 = vld [vmem:[%s2441_s25 + $0xd8] sm:$0xff] }
  0x21   : > { %209 = vperm.xlu1 %2175, %v148_v5   ;;  %204 = vperm.xlu0 %2174, %v147_v6   ;;  %v169_v28 = vld [vmem:[%s2441_s25 + $0xd0] sm:$0xff]  ;;  %v172_v29 = vld [vmem:[%s2441_s25 + $0xe8] sm:$0xff]  ;;  %v171_v30 = vld [vmem:[%s2441_s25 + $0xe0] sm:$0xff] }
  0x22   : > { %v174_v31 = vld [vmem:[%s2441_s25 + $0xf8] sm:$0xff]  ;;  %v173_v32 = vld [vmem:[%s2441_s25 + $0xf0] sm:$0xff] }
  0x25   : > { %219 = vperm.xlu1 %2175, %v150_v7   ;;  %214 = vperm.xlu0 %2174, %v149_v8  }
  0x29   : > { %229 = vperm.xlu1 %2175, %v152_v9   ;;  %224 = vperm.xlu0 %2174, %v151_v10  }
  0x2d   : > { %239 = vperm.xlu1 %2175, %v154_v11   ;;  %234 = vperm.xlu0 %2174, %v153_v12  }
  0x31   : > { %249 = vperm.xlu1 %2175, %v156_v13   ;;  %244 = vperm.xlu0 %2174, %v155_v14  }
  0x35   : > { %259 = vperm.xlu1 %2175, %v158_v15   ;;  %254 = vperm.xlu0 %2174, %v157_v16  }
  0x39   : > { %269 = vperm.xlu1 %2175, %v160_v17   ;;  %264 = vperm.xlu0 %2174, %v159_v18  }
  0x3d   : > { %279 = vperm.xlu1 %2175, %v162_v19   ;;  %274 = vperm.xlu0 %2174, %v161_v20  }
  0x41   : > { %289 = vperm.xlu1 %2175, %v164_v21   ;;  %284 = vperm.xlu0 %2174, %v163_v22  }
  0x45   : > { %299 = vperm.xlu1 %2175, %v166_v23   ;;  %294 = vperm.xlu0 %2174, %v165_v24  }
  0x49   : > { %309 = vperm.xlu1 %2175, %v168_v25   ;;  %304 = vperm.xlu0 %2174, %v167_v26  }
  0x4d   : > { %319 = vperm.xlu1 %2175, %v170_v27   ;;  %314 = vperm.xlu0 %2174, %v169_v28  }
  0x51   : > { %329 = vperm.xlu1 %2175, %v172_v29   ;;  %324 = vperm.xlu0 %2174, %v171_v30  }
  0x55   : > { %375 = vperm.xlu1 %2175, %v174_v31   ;;  %334 = vperm.xlu0 %2174, %v173_v32  }
  0x59   : > { %2177 = vrot.lane.b32.xlu0 %v2481_v35, %s2362_s30 }
  0x5d   : > { %750 = vrot.lane.b32.xlu0 %v2488_v36, %s2362_s30 }
  0x98   : > { %v195_v45 = vpop.permute.xlu1 %194  ;;  %v185_v46 = vpop.permute.xlu0 %184 }
  0x99   : > { %v382_v49 = vmul.f32 %v2497_v43, %v185_v46  ;;  %v384_v50 = vmul.f32 %v2497_v43, %v195_v45  ;;  %v344_v53 = vmul.f32 %v2495_v42, %v195_v45  ;;  %v342_v56 = vmul.f32 %v2495_v42, %v185_v46 }
  0x9a   : > { %v451_v62 = vmul.f32 %v2499_v47, %v195_v45 }
  0x9b   : > { %v414_v57 = vadd.f32 %v382_v49, %v341_v48 }
  0x9c   : > { %v200_v51 = vpop.permute.xlu1 %199  ;;  %v190_v52 = vpop.permute.xlu0 %189 }
  0x9d   : > { %v385_v54 = vmul.f32 %v2497_v43, %v200_v51  ;;  %v343_v55 = vmul.f32 %v2495_v42, %v190_v52  ;;  %v383_v58 = vmul.f32 %v2497_v43, %v190_v52  ;;  %v450_v59 = vmul.f32 %v2499_v47, %v190_v52 }
  0x9e   : > { %v345_v63 = vmul.f32 %v2495_v42, %v200_v51  ;;  %v452_v5 = vmul.f32 %v2499_v47, %v200_v51 }
  0x9f   : > { %v416_v60 = vadd.f32 %v384_v50, %v343_v55  ;;  %v415_v0 = vadd.f32 %v383_v58, %v342_v56  ;;  %v482_v1 = vadd.f32 %v450_v59, %v414_v57  ;;  %v417_v4 = vadd.f32 %v385_v54, %v344_v53 }
  0xa0   : > { %v210_v2 = vpop.permute.xlu1 %209  ;;  %v205_v3 = vpop.permute.xlu0 %204 }
  0xa1   : > { %v387_v6 = vmul.f32 %v2497_v43, %v210_v2  ;;  %v346_v7 = vmul.f32 %v2495_v42, %v205_v3  ;;  %v386_v8 = vmul.f32 %v2497_v43, %v205_v3  ;;  %v453_v9 = vmul.f32 %v2499_v47, %v205_v3 }
  0xa2   : > { %v483_v10 = vadd.f32 %v451_v62, %v415_v0  ;;  %v514_v11 = vadd.f32 %v482_v1, %v2513_v61  ;;  %v347_v12 = vmul.f32 %v2495_v42, %v210_v2  ;;  %v484_v13 = vadd.f32 %v452_v5, %v416_v60 }
  0xa3   : > { %v454_v14 = vmul.f32 %v2499_v47, %v210_v2  ;;  %v418_v15 = vadd.f32 %v386_v8, %v345_v63  ;;  %v485_v16 = vadd.f32 %v453_v9, %v417_v4  ;;  %v419_v20 = vadd.f32 %v387_v6, %v346_v7 }
  0xa4   : > { %v220_v17 = vpop.permute.xlu1 %219  ;;  %v215_v18 = vpop.permute.xlu0 %214  ;;  %v515_v19 = vadd.f32 %v483_v10, %v2513_v61  ;;  %v546_v23 = vmax.f32 %v514_v11, 0.0  ;;  %v516_v27 = vadd.f32 %v484_v13, %v2513_v61 }
  0xa5   : > { %v389_v21 = vmul.f32 %v2497_v43, %v220_v17  ;;  %v348_v22 = vmul.f32 %v2495_v42, %v215_v18  ;;  %v388_v24 = vmul.f32 %v2497_v43, %v215_v18  ;;  %v455_v25 = vmul.f32 %v2499_v47, %v215_v18 }
  0xa6   : > { %v547_v26 = vmax.f32 %v515_v19, 0.0  ;;  %v349_v28 = vmul.f32 %v2495_v42, %v220_v17  ;;  %v517_v29 = vadd.f32 %v485_v16, %v2513_v61  ;;  %v486_v30 = vadd.f32 %v454_v14, %v418_v15 }
  0xa7   : > { %v456_v31 = vmul.f32 %v2499_v47, %v220_v17  ;;  %v420_v32 = vadd.f32 %v388_v24, %v347_v12  ;;  %v487_v33 = vadd.f32 %v455_v25, %v419_v20  ;;  %v421_v39 = vadd.f32 %v389_v21, %v348_v22 }
  0xa8   : > { %v230_v34 = vpop.permute.xlu1 %229  ;;  %v225_v37 = vpop.permute.xlu0 %224  ;;  %v2534_v38 = vmax.f32 %v546_v23, %v547_v26  ;;  %v548_v44 = vmax.f32 %v516_v27, 0.0  ;;  %v549_v48 = vmax.f32 %v517_v29, 0.0  ;;  %v518_v49 = vadd.f32 %v486_v30, %v2513_v61 }
  0xa9   : > { %v391_v40 = vmul.f32 %v2497_v43, %v230_v34  ;;  %v350_v41 = vmul.f32 %v2495_v42, %v225_v37  ;;  %v390_v45 = vmul.f32 %v2497_v43, %v225_v37  ;;  %v457_v46 = vmul.f32 %v2499_v47, %v225_v37 }
  0xaa   : > { %613 = vrot.lane.b32.xlu1 %v2534_v38, %s2363_s14  ;;  %v351_v50 = vmul.f32 %v2495_v42, %v230_v34  ;;  %v519_v51 = vadd.f32 %v487_v33, %v2513_v61  ;;  %v488_v52 = vadd.f32 %v456_v31, %v420_v32  ;;  %v458_v53 = vmul.f32 %v2499_v47, %v230_v34 }
  0xab   : > { %v422_v54 = vadd.f32 %v390_v45, %v349_v28  ;;  %v489_v55 = vadd.f32 %v457_v46, %v421_v39  ;;  %v2546_v56 = vmax.f32 %v548_v44, %v549_v48  ;;  %v423_v59 = vadd.f32 %v391_v40, %v350_v41 }
  0xac   : > { %v240_v57 = vpop.permute.xlu1 %239  ;;  %v235_v58 = vpop.permute.xlu0 %234  ;;  %v550_v63 = vmax.f32 %v518_v49, 0.0  ;;  %v551_v2 = vmax.f32 %v519_v51, 0.0  ;;  %v520_v3 = vadd.f32 %v488_v52, %v2513_v61 }
  0xad   : > { %v393_v60 = vmul.f32 %v2497_v43, %v240_v57  ;;  %v352_v62 = vmul.f32 %v2495_v42, %v235_v58  ;;  %615 = vrot.lane.b32.xlu0 %v2546_v56, %s2363_s14  ;;  %v392_v0 = vmul.f32 %v2497_v43, %v235_v58  ;;  %v459_v1 = vmul.f32 %v2499_v47, %v235_v58 }
  0xae   : > { %661 = vrot.lane.b32.xlu1 %v2546_v56, %s2364_s16  ;;  %v353_v4 = vmul.f32 %v2495_v42, %v240_v57  ;;  %v521_v5 = vadd.f32 %v489_v55, %v2513_v61  ;;  %v490_v6 = vadd.f32 %v458_v53, %v422_v54  ;;  %v460_v7 = vmul.f32 %v2499_v47, %v240_v57 }
  0xaf   : > { %v424_v8 = vadd.f32 %v392_v0, %v351_v50  ;;  %v491_v9 = vadd.f32 %v459_v1, %v423_v59  ;;  %v2560_v10 = vmax.f32 %v550_v63, %v551_v2  ;;  %v425_v13 = vadd.f32 %v393_v60, %v352_v62 }
  0xb0   : > { %v250_v11 = vpop.permute.xlu1 %249  ;;  %v245_v12 = vpop.permute.xlu0 %244  ;;  %v552_v16 = vmax.f32 %v520_v3, 0.0  ;;  %v553_v19 = vmax.f32 %v521_v5, 0.0  ;;  %v522_v20 = vadd.f32 %v490_v6, %v2513_v61 }
  0xb1   : > { %v395_v14 = vmul.f32 %v2497_v43, %v250_v11  ;;  %v354_v15 = vmul.f32 %v2495_v42, %v245_v12  ;;  %617 = vrot.lane.b32.xlu0 %v2560_v10, %s2363_s14  ;;  %v394_v17 = vmul.f32 %v2497_v43, %v245_v12  ;;  %v461_v18 = vmul.f32 %v2499_v47, %v245_v12 }
  0xb2   : > { %663 = vrot.lane.b32.xlu1 %v2560_v10, %s2364_s16  ;;  %v355_v21 = vmul.f32 %v2495_v42, %v250_v11  ;;  %v523_v22 = vadd.f32 %v491_v9, %v2513_v61  ;;  %v492_v23 = vadd.f32 %v460_v7, %v424_v8  ;;  %v462_v24 = vmul.f32 %v2499_v47, %v250_v11 }
  0xb3   : > { %v426_v25 = vadd.f32 %v394_v17, %v353_v4  ;;  %v493_v26 = vadd.f32 %v461_v18, %v425_v13  ;;  %v2574_v27 = vmax.f32 %v552_v16, %v553_v19  ;;  %v427_v30 = vadd.f32 %v395_v14, %v354_v15 }
  0xb4   : > { %v260_v28 = vpop.permute.xlu1 %259  ;;  %v255_v29 = vpop.permute.xlu0 %254  ;;  %v554_v33 = vmax.f32 %v522_v20, 0.0  ;;  %v555_v39 = vmax.f32 %v523_v22, 0.0  ;;  %v524_v40 = vadd.f32 %v492_v23, %v2513_v61 }
  0xb5   : > { %v397_v31 = vmul.f32 %v2497_v43, %v260_v28  ;;  %v356_v32 = vmul.f32 %v2495_v42, %v255_v29  ;;  %665 = vrot.lane.b32.xlu0 %v2574_v27, %s2364_s16  ;;  %v396_v34 = vmul.f32 %v2497_v43, %v255_v29  ;;  %v463_v37 = vmul.f32 %v2499_v47, %v255_v29 }
  0xb6   : > { %619 = vrot.lane.b32.xlu1 %v2574_v27, %s2363_s14  ;;  %v357_v41 = vmul.f32 %v2495_v42, %v260_v28  ;;  %v525_v44 = vadd.f32 %v493_v26, %v2513_v61  ;;  %v494_v45 = vadd.f32 %v462_v24, %v426_v25  ;;  %v464_v46 = vmul.f32 %v2499_v47, %v260_v28 }
  0xb7   : > { %v428_v48 = vadd.f32 %v396_v34, %v355_v21  ;;  %v495_v49 = vadd.f32 %v463_v37, %v427_v30  ;;  %v2588_v50 = vmax.f32 %v554_v33, %v555_v39  ;;  %v429_v53 = vadd.f32 %v397_v31, %v356_v32 }
  0xb8   : > { %v270_v51 = vpop.permute.xlu1 %269  ;;  %v265_v52 = vpop.permute.xlu0 %264  ;;  %v556_v57 = vmax.f32 %v524_v40, 0.0  ;;  %v557_v60 = vmax.f32 %v525_v44, 0.0  ;;  %v526_v62 = vadd.f32 %v494_v45, %v2513_v61 }
  0xb9   : > { %v399_v54 = vmul.f32 %v2497_v43, %v270_v51  ;;  %v358_v55 = vmul.f32 %v2495_v42, %v265_v52  ;;  %621 = vrot.lane.b32.xlu0 %v2588_v50, %s2363_s14  ;;  %v398_v58 = vmul.f32 %v2497_v43, %v265_v52  ;;  %v465_v59 = vmul.f32 %v2499_v47, %v265_v52 }
  0xba   : > { %667 = vrot.lane.b32.xlu1 %v2588_v50, %s2364_s16  ;;  %v359_v63 = vmul.f32 %v2495_v42, %v270_v51  ;;  %v527_v0 = vadd.f32 %v495_v49, %v2513_v61  ;;  %v496_v1 = vadd.f32 %v464_v46, %v428_v48  ;;  %v466_v2 = vmul.f32 %v2499_v47, %v270_v51 }
  0xbb   : > { %v430_v3 = vadd.f32 %v398_v58, %v357_v41  ;;  %v497_v4 = vadd.f32 %v465_v59, %v429_v53  ;;  %v2602_v5 = vmax.f32 %v556_v57, %v557_v60  ;;  %v431_v8 = vadd.f32 %v399_v54, %v358_v55 }
  0xbc   : > { %v280_v6 = vpop.permute.xlu1 %279  ;;  %v275_v7 = vpop.permute.xlu0 %274  ;;  %v558_v12 = vmax.f32 %v526_v62, 0.0  ;;  %v559_v15 = vmax.f32 %v527_v0, 0.0  ;;  %v528_v16 = vadd.f32 %v496_v1, %v2513_v61 }
  0xbd   : > { %v401_v9 = vmul.f32 %v2497_v43, %v280_v6  ;;  %v360_v11 = vmul.f32 %v2495_v42, %v275_v7  ;;  %669 = vrot.lane.b32.xlu0 %v2602_v5, %s2364_s16  ;;  %v400_v13 = vmul.f32 %v2497_v43, %v275_v7  ;;  %v467_v14 = vmul.f32 %v2499_v47, %v275_v7 }
  0xbe   : > { %623 = vrot.lane.b32.xlu1 %v2602_v5, %s2363_s14  ;;  %v361_v17 = vmul.f32 %v2495_v42, %v280_v6  ;;  %v529_v18 = vadd.f32 %v497_v4, %v2513_v61  ;;  %v498_v19 = vadd.f32 %v466_v2, %v430_v3  ;;  %v468_v20 = vmul.f32 %v2499_v47, %v280_v6 }
  0xbf   : > { %v432_v21 = vadd.f32 %v400_v13, %v359_v63  ;;  %v499_v22 = vadd.f32 %v467_v14, %v431_v8  ;;  %v2616_v23 = vmax.f32 %v558_v12, %v559_v15  ;;  %v433_v26 = vadd.f32 %v401_v9, %v360_v11 }
  0xc0   : > { %v290_v24 = vpop.permute.xlu1 %289  ;;  %v285_v25 = vpop.permute.xlu0 %284  ;;  %v560_v30 = vmax.f32 %v528_v16, 0.0  ;;  %v561_v33 = vmax.f32 %v529_v18, 0.0  ;;  %v530_v34 = vadd.f32 %v498_v19, %v2513_v61 }
  0xc1   : > { %v403_v28 = vmul.f32 %v2497_v43, %v290_v24  ;;  %v362_v29 = vmul.f32 %v2495_v42, %v285_v25  ;;  %625 = vrot.lane.b32.xlu0 %v2616_v23, %s2363_s14  ;;  %v402_v31 = vmul.f32 %v2497_v43, %v285_v25  ;;  %v469_v32 = vmul.f32 %v2499_v47, %v285_v25 }
  0xc2   : > { %671 = vrot.lane.b32.xlu1 %v2616_v23, %s2364_s16  ;;  %v363_v37 = vmul.f32 %v2495_v42, %v290_v24  ;;  %v531_v39 = vadd.f32 %v499_v22, %v2513_v61  ;;  %v500_v40 = vadd.f32 %v468_v20, %v432_v21  ;;  %v470_v41 = vmul.f32 %v2499_v47, %v290_v24 }
  0xc3   : > { %v434_v44 = vadd.f32 %v402_v31, %v361_v17  ;;  %v501_v45 = vadd.f32 %v469_v32, %v433_v26  ;;  %v2630_v46 = vmax.f32 %v560_v30, %v561_v33  ;;  %v435_v51 = vadd.f32 %v403_v28, %v362_v29 }
  0xc4   : > { %v300_v48 = vpop.permute.xlu1 %299  ;;  %v295_v49 = vpop.permute.xlu0 %294  ;;  %v562_v54 = vmax.f32 %v530_v34, 0.0  ;;  %v563_v58 = vmax.f32 %v531_v39, 0.0  ;;  %v532_v59 = vadd.f32 %v500_v40, %v2513_v61 }
  0xc5   : > { %v405_v52 = vmul.f32 %v2497_v43, %v300_v48  ;;  %v364_v53 = vmul.f32 %v2495_v42, %v295_v49  ;;  %673 = vrot.lane.b32.xlu0 %v2630_v46, %s2364_s16  ;;  %v404_v55 = vmul.f32 %v2497_v43, %v295_v49  ;;  %v471_v57 = vmul.f32 %v2499_v47, %v295_v49 }
  0xc6   : > { %627 = vrot.lane.b32.xlu1 %v2630_v46, %s2363_s14  ;;  %v365_v60 = vmul.f32 %v2495_v42, %v300_v48  ;;  %v533_v62 = vadd.f32 %v501_v45, %v2513_v61  ;;  %v502_v63 = vadd.f32 %v470_v41, %v434_v44  ;;  %v472_v0 = vmul.f32 %v2499_v47, %v300_v48 }
  0xc7   : > { %v436_v1 = vadd.f32 %v404_v55, %v363_v37  ;;  %v503_v2 = vadd.f32 %v471_v57, %v435_v51  ;;  %v2644_v3 = vmax.f32 %v562_v54, %v563_v58  ;;  %v437_v8 = vadd.f32 %v405_v52, %v364_v53 }
  0xc8   : > { %v310_v4 = vpop.permute.xlu1 %309  ;;  %v305_v6 = vpop.permute.xlu0 %304  ;;  %v564_v11 = vmax.f32 %v532_v59, 0.0  ;;  %v565_v14 = vmax.f32 %v533_v62, 0.0  ;;  %v534_v15 = vadd.f32 %v502_v63, %v2513_v61  ;;  %v481_v62 = vmul.f32 0.0, %v2499_v47 }
  0xc9   : > { %v407_v7 = vmul.f32 %v2497_v43, %v310_v4  ;;  %v366_v9 = vmul.f32 %v2495_v42, %v305_v6  ;;  %629 = vrot.lane.b32.xlu0 %v2644_v3, %s2363_s14  ;;  %v406_v12 = vmul.f32 %v2497_v43, %v305_v6  ;;  %v473_v13 = vmul.f32 %v2499_v47, %v305_v6 }
  0xca   : > { %675 = vrot.lane.b32.xlu1 %v2644_v3, %s2364_s16  ;;  %v367_v16 = vmul.f32 %v2495_v42, %v310_v4  ;;  %v535_v17 = vadd.f32 %v503_v2, %v2513_v61  ;;  %v504_v18 = vadd.f32 %v472_v0, %v436_v1  ;;  %v474_v19 = vmul.f32 %v2499_v47, %v310_v4 }
  0xcb   : > { %v438_v20 = vadd.f32 %v406_v12, %v365_v60  ;;  %v505_v21 = vadd.f32 %v473_v13, %v437_v8  ;;  %v2658_v22 = vmax.f32 %v564_v11, %v565_v14  ;;  %v439_v26 = vadd.f32 %v407_v7, %v366_v9 }
  0xcc   : > { %v320_v24 = vpop.permute.xlu1 %319  ;;  %v315_v25 = vpop.permute.xlu0 %314  ;;  %v566_v30 = vmax.f32 %v534_v15, 0.0  ;;  %v567_v34 = vmax.f32 %v535_v17, 0.0  ;;  %v536_v40 = vadd.f32 %v504_v18, %v2513_v61 }
  0xcd   : > { %v409_v28 = vmul.f32 %v2497_v43, %v320_v24  ;;  %v368_v29 = vmul.f32 %v2495_v42, %v315_v25  ;;  %v506_v31 = vadd.f32 %v474_v19, %v438_v20  ;;  %677 = vrot.lane.b32.xlu0 %v2658_v22, %s2364_s16  ;;  %v408_v32 = vmul.f32 %v2497_v43, %v315_v25 }
  0xce   : > { %v475_v33 = vmul.f32 %v2499_v47, %v315_v25  ;;  %631 = vrot.lane.b32.xlu1 %v2658_v22, %s2363_s14  ;;  %v369_v37 = vmul.f32 %v2495_v42, %v320_v24  ;;  %v476_v39 = vmul.f32 %v2499_v47, %v320_v24  ;;  %v537_v41 = vadd.f32 %v505_v21, %v2513_v61 }
  0xcf   : > { %v440_v44 = vadd.f32 %v408_v32, %v367_v16  ;;  %v441_v45 = vadd.f32 %v409_v28, %v368_v29  ;;  %v2672_v49 = vmax.f32 %v566_v30, %v567_v34  ;;  %v538_v57 = vadd.f32 %v506_v31, %v2513_v61 }
  0xd0   : > { %v507_v48 = vadd.f32 %v475_v33, %v439_v26  ;;  %v330_v51 = vpop.permute.xlu1 %329  ;;  %v325_v52 = vpop.permute.xlu0 %324  ;;  %v568_v0 = vmax.f32 %v536_v40, 0.0  ;;  %v569_v1 = vmax.f32 %v537_v41, 0.0 }
  0xd1   : > { %v371_v53 = vmul.f32 %v2495_v42, %v330_v51  ;;  %v411_v54 = vmul.f32 %v2497_v43, %v330_v51  ;;  %v370_v55 = vmul.f32 %v2495_v42, %v325_v52  ;;  %v508_v58 = vadd.f32 %v476_v39, %v440_v44  ;;  %633 = vrot.lane.b32.xlu0 %v2672_v49, %s2363_s14 }
  0xd2   : > { %v410_v59 = vmul.f32 %v2497_v43, %v325_v52  ;;  %v477_v60 = vmul.f32 %v2499_v47, %v325_v52  ;;  %679 = vrot.lane.b32.xlu1 %v2672_v49, %s2364_s16  ;;  %v478_v63 = vmul.f32 %v2499_v47, %v330_v51  ;;  %v539_v2 = vadd.f32 %v507_v48, %v2513_v61 }
  0xd3   : > { %v443_v6 = vadd.f32 %v411_v54, %v370_v55  ;;  %v540_v11 = vadd.f32 %v508_v58, %v2513_v61  ;;  %v2688_v12 = vmax.f32 %v568_v0, %v569_v1  ;;  %v570_v15 = vmax.f32 %v538_v57, 0.0 }
  0xd4   : > { %v442_v4 = vadd.f32 %v410_v59, %v369_v37  ;;  %v509_v7 = vadd.f32 %v477_v60, %v441_v45  ;;  %v376_v8 = vpop.permute.xlu1 %375  ;;  %v335_v9 = vpop.permute.xlu0 %334  ;;  %v571_v19 = vmax.f32 %v539_v2, 0.0  ;;  %v2365_v55 = vmov 0.0  }
  0xd5   : > { %v413_v13 = vmul.f32 %v2497_v43, %v376_v8  ;;  %v372_v14 = vmul.f32 %v2495_v42, %v335_v9  ;;  %v412_v17 = vmul.f32 %v2497_v43, %v335_v9  ;;  %v479_v18 = vmul.f32 %v2499_v47, %v335_v9  ;;  %681 = vrot.lane.b32.xlu0 %v2688_v12, %s2364_s16 }
  0xd6   : > { %v510_v16 = vadd.f32 %v478_v63, %v442_v4  ;;  %v480_v20 = vmul.f32 %v2499_v47, %v376_v8  ;;  %635 = vrot.lane.b32.xlu1 %v2688_v12, %s2363_s14  ;;  %v541_v24 = vadd.f32 %v509_v7, %v2513_v61  ;;  %v572_v25 = vmax.f32 %v540_v11, 0.0 }
  0xd7   : > { %v445_v21 = vadd.f32 %v413_v13, %v372_v14  ;;  %v444_v42 = vadd.f32 %v412_v17, %v371_v53  ;;  %v511_v26 = vadd.f32 %v479_v18, %v443_v6  ;;  %v2700_v28 = vmax.f32 %v570_v15, %v571_v19 }
  0xd8   : > { %v542_v43 = vadd.f32 %v510_v16, %v2513_v61  ;;  %v2178_v29 = vpop.permute.xlu0 %2177  ;;  %v573_v31 = vmax.f32 %v541_v24, 0.0 }
  0xd9   : > { %v513_v30 = vadd.f32 %v481_v62, %v445_v21  ;;  %v2180_v32 = vunpack.i.h.bf16 %v2178_v29  ;;  %v2179_v33 = vunpack.i.l.bf16 %v2178_v29  ;;  %v512_v34 = vadd.f32 %v480_v20, %v444_v42  ;;  %637 = vrot.lane.b32.xlu0 %v2700_v28, %s2363_s14 }
  0xda   : > { %v543_v47 = vadd.f32 %v511_v26, %v2513_v61  ;;  %683 = vrot.lane.b32.xlu1 %v2700_v28, %s2364_s16  ;;  %v2708_v37 = vmax.f32 %v572_v25, %v573_v31  ;;  %v574_v41 = vmax.f32 %v542_v43, 0.0 }
  0xdb   : > { %v2049_v39 = vpack.c.bf16 %v2180_v32, %v2179_v33  ;;  %v544_v44 = vadd.f32 %v512_v34, %v2513_v61  ;;  %v545_v45 = vadd.f32 %v513_v30, %v2513_v61 }
  0xdc   : > { %v575_v40 = vmax.f32 %v543_v47, 0.0  ;;  %v751_v51 = vpop.permute.xlu0 %750 }
  0xdd   : > { %2050 = vmatprep.subr.bf16.mxu0 %v2049_v39  ;;  %685 = vrot.lane.b32.xlu0 %v2708_v37, %s2364_s16  ;;  %v576_v52 = vmax.f32 %v544_v44, 0.0  ;;  %v577_v53 = vmax.f32 %v545_v45, 0.0 }
  0xde   : > { %2052 = vmatpush3.bf16.msra.mxu0 %v2049_v39  ;;  %639 = vrot.lane.b32.xlu1 %v2708_v37, %s2363_s14  ;;  %v2716_v48 = vmax.f32 %v574_v41, %v575_v40 }
  0xdf   : > { %1923 = vmatprep.subr.mxu0 %v751_v51  ;;  %v593_v54 = vmax.f32 %v576_v52, %v577_v53 }
  0xe1   : > { %641 = vrot.lane.b32.xlu0 %v2716_v48, %s2363_s14 }
  0xe2   : > { %1924 = vmatpush3.msra.mxu0 %v751_v51  ;;  %687 = vrot.lane.b32.xlu1 %v2716_v48, %s2364_s16 }
  0xe5   : > { %689 = vrot.lane.b32.xlu0 %v593_v54, %s2364_s16 }
  0xe6   : > { %643 = vrot.lane.b32.xlu1 %v593_v54, %s2363_s14 }
  0xe9   : > { %756 = vrot.lane.b32.xlu0 %v2513_v61, %s2362_s30  ;;  %s2369_s30 = smov 64  }
  0xea   : > { %691 = vrot.lane.b32.xlu1 %v2365_v55, %s2364_s16 }
  0xee   : > { %2182 = vrot.lane.b32.xlu1 %v2481_v35, %s2366_s22 }
 0x11c   : > { %v614_v57 = vpop.permute.xlu1 %613 }
 0x11d   : > { %v710_v58 = vsel %vm709_vm0, 0.0, %v614_v57 }
 0x11f   : > { %v616_v59 = vpop.permute.xlu0 %615 }
 0x120   : > { %v662_v60 = vpop.permute.xlu1 %661  ;;  %v711_v63 = vsel %vm709_vm0, %v2534_v38, %v616_v59 }
 0x121   : > { %v727_v62 = vsel %vm726_vm1, %v710_v58, %v662_v60 }
 0x122   : > { %1925 = vmatprep.mubr.msk.f32.mxu0 %vm759_vm2, %v727_v62 }
 0x123   : > { %v618_v0 = vpop.permute.xlu0 %617 }
 0x124   : > { %v664_v1 = vpop.permute.xlu1 %663  ;;  %v712_v4 = vsel %vm709_vm0, %v2546_v56, %v618_v0  ;;  %v2794_v0 = vld [vmem:[%s3174_s1 + $0x30] sm:$0xff] }
 0x125   : > { %v728_v2 = vsel %vm726_vm1, %v711_v63, %v664_v1  ;;  %v2809_v1 = vld [vmem:[%s3174_s1 + $0x50] sm:$0xff] }
 0x126   : > { %1926 = vmatmul.mubr.msk.f32.vlgmr.msra.gmra.mrb[0].mxu0 %vm759_vm2, %v728_v2 }
 0x127   : > { %v666_v6 = vpop.permute.xlu0 %665 }
 0x128   : > { %v620_v7 = vpop.permute.xlu1 %619  ;;  %v729_v8 = vsel %vm726_vm1, %v712_v4, %v666_v6 }
 0x129   : > { %1928 = vmatprep.mubr.msk.f32.mxu0 %vm759_vm2, %v729_v8  ;;  %v713_v9 = vsel %vm709_vm0, %v2560_v10, %v620_v7 }
 0x12b   : > { %v622_v11 = vpop.permute.xlu0 %621 }
 0x12c   : > { %v668_v38 = vpop.permute.xlu1 %667  ;;  %v714_v14 = vsel %vm709_vm0, %v2574_v27, %v622_v11 }
 0x12d   : > { %v730_v13 = vsel %vm726_vm1, %v713_v9, %v668_v38 }
 0x12e   : > { %1929 = vmatmul.mubr.msk.f32.gmra.mrb[2].mxu0 %vm759_vm2, %v730_v13 }
 0x12f   : > { %v670_v15 = vpop.permute.xlu0 %669 }
 0x130   : > { %v624_v56 = vpop.permute.xlu1 %623  ;;  %v731_v16 = vsel %vm726_vm1, %v714_v14, %v670_v15 }
 0x131   : > { %1931 = vmatprep.mubr.msk.f32.mxu0 %vm759_vm2, %v731_v16  ;;  %v715_v17 = vsel %vm709_vm0, %v2588_v50, %v624_v56 }
 0x133   : > { %v626_v18 = vpop.permute.xlu0 %625 }
 0x134   : > { %v672_v10 = vpop.permute.xlu1 %671  ;;  %v716_v20 = vsel %vm709_vm0, %v2602_v5, %v626_v18 }
 0x135   : > { %v732_v19 = vsel %vm726_vm1, %v715_v17, %v672_v10 }
 0x136   : > { %1932 = vmatmul.mubr.msk.f32.gmra.mrb[4].mxu0 %vm759_vm2, %v732_v19 }
 0x137   : > { %v674_v21 = vpop.permute.xlu0 %673 }
 0x138   : > { %v628_v27 = vpop.permute.xlu1 %627  ;;  %v733_v24 = vsel %vm726_vm1, %v716_v20, %v674_v21 }
 0x139   : > { %1934 = vmatprep.mubr.msk.f32.mxu0 %vm759_vm2, %v733_v24  ;;  %v717_v25 = vsel %vm709_vm0, %v2616_v23, %v628_v27 }
 0x13b   : > { %v630_v42 = vpop.permute.xlu0 %629 }
 0x13c   : > { %v676_v50 = vpop.permute.xlu1 %675  ;;  %v718_v43 = vsel %vm709_vm0, %v2630_v46, %v630_v42 }
 0x13d   : > { %v734_v26 = vsel %vm726_vm1, %v717_v25, %v676_v50 }
 0x13e   : > { %1935 = vmatmul.mubr.msk.f32.gmra.mrb[6].mxu0 %vm759_vm2, %v734_v26 }
 0x13f   : > { %v678_v29 = vpop.permute.xlu0 %677 }
 0x140   : > { %v632_v5 = vpop.permute.xlu1 %631  ;;  %v735_v30 = vsel %vm726_vm1, %v718_v43, %v678_v29 }
 0x141   : > { %1937 = vmatprep.mubr.msk.f32.mxu0 %vm759_vm2, %v735_v30  ;;  %v719_v31 = vsel %vm709_vm0, %v2644_v3, %v632_v5 }
 0x143   : > { %v634_v32 = vpop.permute.xlu0 %633 }
 0x144   : > { %v680_v23 = vpop.permute.xlu1 %679  ;;  %v720_v34 = vsel %vm709_vm0, %v2658_v22, %v634_v32 }
 0x145   : > { %v736_v33 = vsel %vm726_vm1, %v719_v31, %v680_v23 }
 0x146   : > { %1938 = vmatmul.mubr.msk.f32.gmra.mrb[8].mxu0 %vm759_vm2, %v736_v33 }
 0x147   : > { %v682_v47 = vpop.permute.xlu0 %681 }
 0x148   : > { %v636_v46 = vpop.permute.xlu1 %635  ;;  %v737_v39 = vsel %vm726_vm1, %v720_v34, %v682_v47 }
 0x149   : > { %1940 = vmatprep.mubr.msk.f32.mxu0 %vm759_vm2, %v737_v39  ;;  %v721_v40 = vsel %vm709_vm0, %v2672_v49, %v636_v46 }
 0x14b   : > { %v638_v41 = vpop.permute.xlu0 %637 }
 0x14c   : > { %v684_v3 = vpop.permute.xlu1 %683  ;;  %v722_v45 = vsel %vm709_vm0, %v2688_v12, %v638_v41 }
 0x14d   : > { %v738_v44 = vsel %vm726_vm1, %v721_v40, %v684_v3 }
 0x14e   : > { %1941 = vmatmul.mubr.msk.f32.gmra.mrb[10].mxu0 %vm759_vm2, %v738_v44 }
 0x14f   : > { %v686_v51 = vpop.permute.xlu0 %685 }
 0x150   : > { %v640_v22 = vpop.permute.xlu1 %639  ;;  %v739_v52 = vsel %vm726_vm1, %v722_v45, %v686_v51 }
 0x151   : > { %1943 = vmatprep.mubr.msk.f32.mxu0 %vm759_vm2, %v739_v52  ;;  %v723_v53 = vsel %vm709_vm0, %v2700_v28, %v640_v22 }
 0x153   : > { %v642_v54 = vpop.permute.xlu0 %641 }
 0x154   : > { %v688_v49 = vpop.permute.xlu1 %687  ;;  %v724_v58 = vsel %vm709_vm0, %v2708_v37, %v642_v54  ;;  %v2186_v37 = vpack.i.bf16 %v2794_v0, %v2488_v36 }
 0x155   : > { %v740_v57 = vsel %vm726_vm1, %v723_v53, %v688_v49 }
 0x156   : > { %1944 = vmatmul.mubr.msk.f32.gmra.mrb[12].mxu0 %vm759_vm2, %v740_v57  ;;  %2187 = vrot.lane.b32.xlu0 %v2186_v37, %s2366_s22 }
 0x157   : > { %v690_v59 = vpop.permute.xlu0 %689 }
 0x158   : > { %v644_v12 = vpop.permute.xlu1 %643  ;;  %v741_v60 = vsel %vm726_vm1, %v724_v58, %v690_v59 }
 0x159   : > { %1946 = vmatprep.mubr.msk.f32.mxu0 %vm759_vm2, %v741_v60  ;;  %v725_v62 = vsel %vm709_vm0, %v2716_v48, %v644_v12  ;;  %v2804_v48 = vld [vmem:[%s3174_s1 + $0x40] sm:$0xff] }
 0x15a   : > { %v2813_v2 = vpack.i.bf16 %v2809_v1, %v2804_v48 }
 0x15b   : > { %v2817_v35 = vpop.permute.xlu0 %756 }
 0x15c   : > { %v692_v63 = vpop.permute.xlu1 %691  ;;  %2192 = vrot.lane.b32.xlu1 %v2813_v2, %s2366_s22 }
 0x15d   : > { %v742_v28 = vsel %vm726_vm1, %v725_v62, %v692_v63 }
 0x15e   : > { %1947 = vmatmul.mubr.msk.f32.gmra.mrb[14].mxu0 %vm759_vm2, %v742_v28 }
 0x160   : > { %v2183_v36 = vpop.permute.xlu1 %2182 }
 0x161   : > { %v2185_v6 = vunpack.i.h.bf16 %v2183_v36  ;;  %v2184_v7 = vunpack.i.l.bf16 %v2183_v36 }
 0x163   : > { %v2053_v11 = vpack.c.bf16 %v2185_v6, %v2184_v7 }
 0x165   : > { %2054 = vmatprep.subr.bf16.mxu0 %v2053_v11 }
 0x166   : > { %2056 = vmatpush3.bf16.msra.mxu0 %v2053_v11 }
 0x1c8   : > { %v2188_v4 = vpop.permute.xlu0 %2187 }
 0x1c9   : > { %v2190_v8 = vunpack.i.h.bf16 %v2188_v4  ;;  %v2189_v9 = vunpack.i.l.bf16 %v2188_v4 }
 0x1cb   : > { %v2057_v38 = vpack.c.bf16 %v2190_v8, %v2189_v9 }
 0x1cd   : > { %2058 = vmatprep.subr.bf16.mxu0 %v2057_v38 }
 0x1ce   : > { %v2193_v16 = vpop.permute.xlu1 %2192  ;;  %2060 = vmatpush3.bf16.msra.mxu0 %v2057_v38 }
 0x1cf   : > { %v2195_v18 = vunpack.i.h.bf16 %v2193_v16  ;;  %v2194_v10 = vunpack.i.l.bf16 %v2193_v16  ;;  %v2881_v16 = vld [vmem:[%s3174_s1 + $0x10] sm:$0xff] }
 0x1d1   : > { %v2061_v20 = vpack.c.bf16 %v2195_v18, %v2194_v10 }
 0x1d3   : > { %2062 = vmatprep.subr.bf16.mxu0 %v2061_v20 }
 0x1d4   : > { %2064 = vmatpush3.bf16.msra.mxu0 %v2061_v20 }
 0x1f9   : > { %v1927_v13 = vpop.f32.mrb[0].mxu0 }
 0x1fa   : > { %v880_v14 = vadd.f32 %v1927_v13, %v2817_v35  ;;  %v874_v15 = vpop.f32.mrb[1].mxu0 }
 0x1fb   : > { %v875_v56 = vadd.f32 %v874_v15, %v2817_v35 }
 0x1fc   : > { %v954_v17 = vmax.f32 %v880_v14, 0.0 }
 0x1fd   : > { %v953_v19 = vmax.f32 %v875_v56, 0.0  ;;  %v2876_v56 = vld [vmem:[%s3174_s1] sm:$0xff] }
 0x1ff   : > { %v2821_v21 = vmax.f32 %v953_v19, %v954_v17 }
 0x201   : > { %v1930_v27 = vpop.f32.mrb[2].mxu0  ;;  %991 = vrot.lane.b32.xlu0 %v2821_v21, %s2364_s16 }
 0x202   : > { %v890_v24 = vadd.f32 %v1930_v27, %v2817_v35  ;;  %v884_v25 = vpop.f32.mrb[3].mxu0 }
 0x203   : > { %v885_v42 = vadd.f32 %v884_v25, %v2817_v35 }
 0x204   : > { %v956_v50 = vmax.f32 %v890_v24, 0.0 }
 0x205   : > { %v955_v26 = vmax.f32 %v885_v42, 0.0 }
 0x207   : > { %v2827_v43 = vmax.f32 %v955_v26, %v956_v50 }
 0x209   : > { %v1933_v29 = vpop.f32.mrb[4].mxu0  ;;  %993 = vrot.lane.b32.xlu1 %v2827_v43, %s2364_s16  ;;  %1015 = vrot.lane.b32.xlu0 %v2827_v43, %s2367_s27 }
 0x20a   : > { %v900_v5 = vadd.f32 %v1933_v29, %v2817_v35  ;;  %v894_v30 = vpop.f32.mrb[5].mxu0 }
 0x20b   : > { %v895_v31 = vadd.f32 %v894_v30, %v2817_v35 }
 0x20c   : > { %v958_v32 = vmax.f32 %v900_v5, 0.0 }
 0x20d   : > { %v957_v23 = vmax.f32 %v895_v31, 0.0 }
 0x20f   : > { %v2835_v33 = vmax.f32 %v957_v23, %v958_v32 }
 0x211   : > { %v1936_v34 = vpop.f32.mrb[6].mxu0  ;;  %1017 = vrot.lane.b32.xlu1 %v2835_v33, %s2367_s27  ;;  %995 = vrot.lane.b32.xlu0 %v2835_v33, %s2364_s16 }
 0x212   : > { %v910_v47 = vadd.f32 %v1936_v34, %v2817_v35  ;;  %v904_v46 = vpop.f32.mrb[7].mxu0 }
 0x213   : > { %v905_v39 = vadd.f32 %v904_v46, %v2817_v35 }
 0x214   : > { %v960_v40 = vmax.f32 %v910_v47, 0.0 }
 0x215   : > { %v959_v41 = vmax.f32 %v905_v39, 0.0 }
 0x217   : > { %v2843_v3 = vmax.f32 %v959_v41, %v960_v40 }
 0x219   : > { %v1939_v44 = vpop.f32.mrb[8].mxu0  ;;  %997 = vrot.lane.b32.xlu1 %v2843_v3, %s2364_s16  ;;  %1019 = vrot.lane.b32.xlu0 %v2843_v3, %s2367_s27 }
 0x21a   : > { %v920_v45 = vadd.f32 %v1939_v44, %v2817_v35  ;;  %v914_v51 = vpop.f32.mrb[9].mxu0 }
 0x21b   : > { %v915_v22 = vadd.f32 %v914_v51, %v2817_v35 }
 0x21c   : > { %v962_v52 = vmax.f32 %v920_v45, 0.0 }
 0x21d   : > { %v961_v53 = vmax.f32 %v915_v22, 0.0  ;;  %v2925_v22 = vld [vmem:[%s3174_s1 + $0x80] sm:$0xff] }
 0x21f   : > { %v2851_v54 = vmax.f32 %v961_v53, %v962_v52  ;;  %v2930_v52 = vld [vmem:[%s3174_s1 + $0x90] sm:$0xff] }
 0x220   : > { %v2216_v53 = vpack.i.bf16 %v2930_v52, %v2925_v22 }
 0x221   : > { %1021 = vrot.lane.b32.xlu1 %v2851_v54, %s2367_s27  ;;  %999 = vrot.lane.b32.xlu0 %v2851_v54, %s2364_s16  ;;  %v1942_v49 = vpop.f32.mrb[10].mxu0 }
 0x222   : > { %v930_v57 = vadd.f32 %v1942_v49, %v2817_v35  ;;  %v924_v58 = vpop.f32.mrb[11].mxu0  ;;  %v2943_v49 = vld [vmem:[%s3174_s1 + $0x60] sm:$0xff] }
 0x223   : > { %v925_v59 = vadd.f32 %v924_v58, %v2817_v35 }
 0x224   : > { %v964_v12 = vmax.f32 %v930_v57, 0.0  ;;  %v2948_v57 = vld [vmem:[%s3174_s1 + $0x70] sm:$0xff] }
 0x225   : > { %v963_v60 = vmax.f32 %v925_v59, 0.0  ;;  %v2211_v59 = vpack.i.bf16 %v2948_v57, %v2943_v49 }
 0x227   : > { %v2859_v62 = vmax.f32 %v963_v60, %v964_v12  ;;  %v1235_v12 = vld [vmem:[%s3174_s1 + $0xa0] sm:$0xff]  ;;  %v1236_v60 = vld [vmem:[%s3174_s1 + $0xb0] sm:$0xff] }
 0x229   : > { %v1945_v63 = vpop.f32.mrb[12].mxu0  ;;  %1001 = vrot.lane.b32.xlu1 %v2859_v62, %s2364_s16  ;;  %1023 = vrot.lane.b32.xlu0 %v2859_v62, %s2367_s27 }
 0x22a   : > { %v940_v28 = vadd.f32 %v1945_v63, %v2817_v35  ;;  %v934_v37 = vpop.f32.mrb[13].mxu0 }
 0x22b   : > { %v935_v36 = vadd.f32 %v934_v37, %v2817_v35 }
 0x22c   : > { %v966_v4 = vmax.f32 %v940_v28, 0.0 }
 0x22d   : > { %v965_v6 = vmax.f32 %v935_v36, 0.0 }
 0x22f   : > { %v975_v7 = vmax.f32 %v965_v6, %v966_v4 }
 0x231   : > { %v1948_v8 = vpop.f32.mrb[14].mxu0  ;;  %1025 = vrot.lane.b32.xlu1 %v975_v7, %s2367_s27  ;;  %1003 = vrot.lane.b32.xlu0 %v975_v7, %s2364_s16 }
 0x232   : > { %v950_v9 = vadd.f32 %v1948_v8, %v2817_v35  ;;  %v944_v11 = vpop.f32.mrb[15].mxu0 }
 0x233   : > { %v945_v38 = vadd.f32 %v944_v11, %v2817_v35  ;;  %v2196_v35 = vpack.i.bf16 %v2881_v16, %v2876_v56 }
 0x234   : > { %v968_v13 = vmax.f32 %v950_v9, 0.0 }
 0x235   : > { %v967_v14 = vmax.f32 %v945_v38, 0.0 }
 0x237   : > { %v976_v15 = vmax.f32 %v967_v14, %v968_v13 }
 0x239   : > { %1005 = vrot.lane.b32.xlu1 %v976_v15, %s2364_s16  ;;  %1027 = vrot.lane.b32.xlu0 %v976_v15, %s2367_s27 }
 0x23d   : > { %1029 = vrot.lane.b32.xlu1 %v2365_v55, %s2367_s27  ;;  %1080 = vrot.lane.b32.xlu0 %v2513_v61, %s2366_s22  ;;  %s1844_s22 = sshll.u32 %s2410_s13, 4  ;;  %s2373_s13 = smov [#allocation2]  }
 0x23e   : > { %s3131_s28 = scalar_lea.hbm %s3175_s2, %s1844_s22  ;;  %s2301_s3 = sshll.u32 %s2373_s13, 4  ;;  %s2302_s3 = int_to_ptr.vmem [resolvable:$false] %s2301_s3 }
 0x241   : > { %2197 = vrot.lane.b32.xlu1 %v2196_v35, %s2368_s4 }
 0x245   : > { %2207 = vrot.lane.b32.xlu1 %v2813_v2, %s2368_s4 }
 0x249   : > { %2217 = vrot.lane.b32.xlu1 %v2216_v53, %s2368_s4 }
 0x273   : > { %v992_v17 = vpop.permute.xlu0 %991 }
 0x274   : > { %v1039_v18 = vsel %vm726_vm1, 0.0, %v992_v17 }
 0x27b   : > { %v1016_v10 = vpop.permute.xlu0 %1015  ;;  %v994_v61 = vpop.permute.xlu1 %993 }
 0x27c   : > { %v1048_v19 = vsel %vm1047_vm3, %v1039_v18, %v1016_v10  ;;  %v1040_v20 = vsel %vm726_vm1, %v2821_v21, %v994_v61 }
 0x27d   : > { %1961 = vmatprep.mubr.msk.f32.mxu0 %vm1083_vm4, %v1048_v19 }
 0x283   : > { %v1018_v27 = vpop.permute.xlu1 %1017  ;;  %v996_v2 = vpop.permute.xlu0 %995 }
 0x284   : > { %v1049_v24 = vsel %vm1047_vm3, %v1040_v20, %v1018_v27  ;;  %v1041_v25 = vsel %vm726_vm1, %v2827_v43, %v996_v2 }
 0x285   : > { %1962 = vmatmul.mubr.msk.f32.vlgmr.msra.gmra.mrb[16].mxu0 %vm1083_vm4, %v1049_v24 }
 0x28b   : > { %v1020_v42 = vpop.permute.xlu0 %1019  ;;  %v998_v26 = vpop.permute.xlu1 %997 }
 0x28c   : > { %v1050_v50 = vsel %vm1047_vm3, %v1041_v25, %v1020_v42  ;;  %v1042_v29 = vsel %vm726_vm1, %v2835_v33, %v998_v26 }
 0x28d   : > { %1964 = vmatprep.mubr.msk.f32.mxu0 %vm1083_vm4, %v1050_v50 }
 0x293   : > { %v1022_v5 = vpop.permute.xlu1 %1021  ;;  %v1000_v30 = vpop.permute.xlu0 %999 }
 0x294   : > { %v1051_v21 = vsel %vm1047_vm3, %v1042_v29, %v1022_v5  ;;  %v1043_v31 = vsel %vm726_vm1, %v2843_v3, %v1000_v30 }
 0x295   : > { %1965 = vmatmul.mubr.msk.f32.gmra.mrb[18].mxu0 %vm1083_vm4, %v1051_v21 }
 0x29b   : > { %v1024_v32 = vpop.permute.xlu0 %1023  ;;  %v1002_v23 = vpop.permute.xlu1 %1001 }
 0x29c   : > { %v1052_v43 = vsel %vm1047_vm3, %v1043_v31, %v1024_v32  ;;  %v1044_v34 = vsel %vm726_vm1, %v2851_v54, %v1002_v23  ;;  %v2938_v54 = vld [vmem:[%s3174_s1 + $0x20] sm:$0xff] }
 0x29d   : > { %1967 = vmatprep.mubr.msk.f32.mxu0 %vm1083_vm4, %v1052_v43  ;;  %v2201_v58 = vpack.i.bf16 %v2794_v0, %v2938_v54 }
 0x29f   : > { %2202 = vrot.lane.b32.xlu0 %v2201_v58, %s2368_s4 }
 0x2a3   : > { %v1026_v47 = vpop.permute.xlu1 %1025  ;;  %v1004_v46 = vpop.permute.xlu0 %1003  ;;  %2212 = vrot.lane.b32.xlu0 %v2211_v59, %s2368_s4 }
 0x2a4   : > { %v1053_v33 = vsel %vm1047_vm3, %v1044_v34, %v1026_v47  ;;  %v1045_v39 = vsel %vm726_vm1, %v2859_v62, %v1004_v46  ;;  %v2221_v62 = vpack.i.bf16 %v1236_v60, %v1235_v12 }
 0x2a5   : > { %1968 = vmatmul.mubr.msk.f32.gmra.mrb[20].mxu0 %vm1083_vm4, %v1053_v33 }
 0x2a7   : > { %2222 = vrot.lane.b32.xlu0 %v2221_v62, %s2368_s4  ;;  %v2986_v62 = vld [vmem:[%s3174_s1 + $0x8] sm:$0xff] }
 0x2ab   : > { %v1006_v40 = vpop.permute.xlu1 %1005  ;;  %v1028_v41 = vpop.permute.xlu0 %1027 }
 0x2ac   : > { %v1054_v3 = vsel %vm1047_vm3, %v1045_v39, %v1028_v41  ;;  %v1046_v44 = vsel %vm726_vm1, %v975_v7, %v1006_v40 }
 0x2ad   : > { %1970 = vmatprep.mubr.msk.f32.mxu0 %vm1083_vm4, %v1054_v3 }
 0x2af   : > { %v1030_v45 = vpop.permute.xlu1 %1029  ;;  %v2963_v36 = vpop.permute.xlu0 %1080 }
 0x2b0   : > { %v1055_v51 = vsel %vm1047_vm3, %v1046_v44, %v1030_v45 }
 0x2b1   : > { %1971 = vmatmul.mubr.msk.f32.gmra.mrb[22].mxu0 %vm1083_vm4, %v1055_v51 }
 0x2b3   : > { %v2198_v63 = vpop.permute.xlu1 %2197 }
 0x2b4   : > { %v2200_v28 = vunpack.i.h.bf16 %v2198_v63  ;;  %v2199_v37 = vunpack.i.l.bf16 %v2198_v63 }
 0x2b6   : > { %v2065_v6 = vpack.c.bf16 %v2200_v28, %v2199_v37  ;;  %v2226_v28 = vpack.i.bf16 %v2986_v62, %v2876_v56  ;;  %v2994_v37 = vld [vmem:[%s3174_s1 + $0x28] sm:$0xff] }
 0x2b7   : > { %v2208_v4 = vpop.permute.xlu1 %2207 }
 0x2b8   : > { %v2210_v7 = vunpack.i.h.bf16 %v2208_v4  ;;  %v2209_v8 = vunpack.i.l.bf16 %v2208_v4  ;;  %2066 = vmatprep.subr.bf16.mxu1 %v2065_v6  ;;  %v2236_v4 = vpack.i.bf16 %v2994_v37, %v2938_v54 }
 0x2b9   : > { %2068 = vmatpush3.bf16.msra.mxu1 %v2065_v6  ;;  %v3010_v6 = vld [vmem:[%s3174_s1 + $0x48] sm:$0xff] }
 0x2ba   : > { %v2073_v14 = vpack.c.bf16 %v2210_v7, %v2209_v8  ;;  %v3015_v7 = vld [vmem:[%s3174_s1 + $0x38] sm:$0xff]  ;;  %v2246_v54 = vpack.i.bf16 %v3010_v6, %v2804_v48  ;;  %v3045_v48 = vld [vmem:[%s3174_s1 + $0xc0] ss:$0 sm:$0xff] }
 0x2bb   : > { %v2218_v27 = vpop.permute.xlu1 %2217  ;;  %v3026_v8 = vld [vmem:[%s3174_s1 + $0x58] sm:$0xff] }
 0x2bc   : > { %v2220_v2 = vunpack.i.h.bf16 %v2218_v27  ;;  %v2219_v25 = vunpack.i.l.bf16 %v2218_v27 }
 0x2be   : > { %v2081_v26 = vpack.c.bf16 %v2220_v2, %v2219_v25 }
 0x311   : > { %v2203_v9 = vpop.permute.xlu0 %2202 }
 0x312   : > { %v2205_v11 = vunpack.i.h.bf16 %v2203_v9  ;;  %v2204_v38 = vunpack.i.l.bf16 %v2203_v9  ;;  %v2251_v9 = vpack.i.bf16 %v3026_v8, %v2809_v1 }
 0x314   : > { %v2069_v15 = vpack.c.bf16 %v2205_v11, %v2204_v38  ;;  %v3035_v11 = vld [vmem:[%s3174_s1 + $0x68] sm:$0xff] }
 0x315   : > { %v2213_v18 = vpop.permute.xlu0 %2212  ;;  %v2256_v1 = vpack.i.bf16 %v3035_v11, %v2943_v49 }
 0x316   : > { %v2215_v19 = vunpack.i.h.bf16 %v2213_v18  ;;  %v2214_v61 = vunpack.i.l.bf16 %v2213_v18  ;;  %2070 = vmatprep.subr.bf16.mxu1 %v2069_v15 }
 0x317   : > { %2072 = vmatpush3.bf16.msra.mxu1 %v2069_v15 }
 0x318   : > { %v2077_v42 = vpack.c.bf16 %v2215_v19, %v2214_v61  ;;  %2074 = vmatprep.subr.bf16.mxu1 %v2073_v14 }
 0x319   : > { %v2223_v29 = vpop.permute.xlu0 %2222 }
 0x31a   : > { %v2225_v5 = vunpack.i.h.bf16 %v2223_v29  ;;  %v2224_v21 = vunpack.i.l.bf16 %v2223_v29 }
 0x31b   : > { %2076 = vmatpush3.bf16.msra.mxu1 %v2073_v14 }
 0x31c   : > { %2078 = vmatprep.subr.bf16.mxu1 %v2077_v42  ;;  %v2085_v30 = vpack.c.bf16 %v2225_v5, %v2224_v21 }
 0x31f   : > { %2080 = vmatpush3.bf16.msra.mxu1 %v2077_v42 }
 0x320   : > { %2082 = vmatprep.subr.bf16.mxu1 %v2081_v26 }
 0x323   : > { %2084 = vmatpush3.bf16.msra.mxu1 %v2081_v26 }
 0x324   : > { %2086 = vmatprep.subr.bf16.mxu1 %v2085_v30 }
 0x327   : > { %2088 = vmatpush3.bf16.msra.mxu1 %v2085_v30 }
 0x358   : > { %v1963_v13 = vpop.f32.mrb[16].mxu0 }
 0x359   : > { %v1180_v35 = vadd.f32 %v1963_v13, %v2963_v36  ;;  %v1174_v17 = vpop.f32.mrb[17].mxu0 }
 0x35a   : > { %v1175_v10 = vadd.f32 %v1174_v17, %v2963_v36 }
 0x35b   : > { %v1214_v20 = vmax.f32 %v1180_v35, 0.0 }
 0x35c   : > { %v1213_v24 = vmax.f32 %v1175_v10, 0.0 }
 0x35e   : > { %v2967_v50 = vmax.f32 %v1213_v24, %v1214_v20 }
 0x360   : > { %1241 = vrot.lane.b32.xlu1 %v2967_v50, %s2367_s27 }
 0x368   : > { %v1966_v31 = vpop.f32.mrb[18].mxu0 }
 0x369   : > { %v1190_v32 = vadd.f32 %v1966_v31, %v2963_v36  ;;  %v1184_v43 = vpop.f32.mrb[19].mxu0 }
 0x36a   : > { %v1185_v23 = vadd.f32 %v1184_v43, %v2963_v36 }
 0x36b   : > { %v1216_v34 = vmax.f32 %v1190_v32, 0.0 }
 0x36c   : > { %v1215_v47 = vmax.f32 %v1185_v23, 0.0 }
 0x36e   : > { %v2973_v33 = vmax.f32 %v1215_v47, %v1216_v34 }
 0x370   : > { %1243 = vrot.lane.b32.xlu0 %v2973_v33, %s2367_s27  ;;  %1253 = vrot.lane.b32.xlu1 %v2973_v33, %s2369_s30 }
 0x378   : > { %v1969_v46 = vpop.f32.mrb[20].mxu0 }
 0x379   : > { %v1200_v39 = vadd.f32 %v1969_v46, %v2963_v36  ;;  %v1194_v40 = vpop.f32.mrb[21].mxu0 }
 0x37a   : > { %v1195_v41 = vadd.f32 %v1194_v40, %v2963_v36 }
 0x37b   : > { %v1218_v3 = vmax.f32 %v1200_v39, 0.0 }
 0x37c   : > { %v1217_v44 = vmax.f32 %v1195_v41, 0.0 }
 0x37e   : > { %v1223_v45 = vmax.f32 %v1217_v44, %v1218_v3 }
 0x380   : > { %1255 = vrot.lane.b32.xlu0 %v1223_v45, %s2369_s30  ;;  %1245 = vrot.lane.b32.xlu1 %v1223_v45, %s2367_s27 }
 0x384   : > { %v1972_v51 = vpop.f32.mrb[22].mxu0 }
 0x385   : > { %v1210_v53 = vadd.f32 %v1972_v51, %v2963_v36  ;;  %v1204_v58 = vpop.f32.mrb[23].mxu0 }
 0x386   : > { %v1205_v59 = vadd.f32 %v1204_v58, %v2963_v36  ;;  %v2999_v36 = vld [vmem:[%s3174_s1 + $0x18] sm:$0xff] }
 0x387   : > { %v1220_v12 = vmax.f32 %v1210_v53, 0.0  ;;  %v2231_v56 = vpack.i.bf16 %v2999_v36, %v2881_v16  ;;  %v2241_v16 = vpack.i.bf16 %v3015_v7, %v2794_v0  ;;  %v3040_v0 = vld [vmem:[%s3174_s1 + $0x78] sm:$0xff] }
 0x388   : > { %v1219_v60 = vmax.f32 %v1205_v59, 0.0  ;;  %v2261_v38 = vpack.i.bf16 %v3040_v0, %v2948_v57 }
 0x38a   : > { %v1224_v63 = vmax.f32 %v1219_v60, %v1220_v12 }
 0x38c   : > { %1247 = vrot.lane.b32.xlu0 %v1224_v63, %s2367_s27  ;;  %1257 = vrot.lane.b32.xlu1 %v1224_v63, %s2369_s30 }
 0x390   : > { %1259 = vrot.lane.b32.xlu0 %v2365_v55, %s2369_s30  ;;  %2227 = vrot.lane.b32.xlu1 %v2226_v28, %s2363_s14 }
 0x394   : > { %2237 = vrot.lane.b32.xlu1 %v2236_v4, %s2363_s14  ;;  %2232 = vrot.lane.b32.xlu0 %v2231_v56, %s2363_s14 }
 0x398   : > { %2247 = vrot.lane.b32.xlu1 %v2246_v54, %s2363_s14  ;;  %2242 = vrot.lane.b32.xlu0 %v2241_v16, %s2363_s14 }
 0x39c   : > { %1322 = vrot.lane.b32.xlu1 %v3045_v48, %s2368_s4  ;;  %2252 = vrot.lane.b32.xlu0 %v2251_v9, %s2363_s14  ;;  %s2370_s4 = smov 40  }
 0x3a0   : > { %2257 = vrot.lane.b32.xlu0 %v2256_v1, %s2363_s14  ;;  %2262 = vrot.lane.b32.xlu1 %v2261_v38, %s2363_s14 }
 0x3d2   : > { %v1242_v13 = vpop.permute.xlu1 %1241 }
 0x3d3   : > { %v1265_v14 = vsel %vm1047_vm3, 0.0, %v1242_v13 }
 0x3e2   : > { %v1254_v15 = vpop.permute.xlu1 %1253  ;;  %v1244_v17 = vpop.permute.xlu0 %1243 }
 0x3e3   : > { %v1270_v35 = vsel %vm1269_vm5, %v1265_v14, %v1254_v15  ;;  %v1266_v49 = vsel %vm1047_vm3, %v2967_v50, %v1244_v17  ;;  %v2266_v14 = vpack.i.bf16 %v2999_v36, %v2986_v62  ;;  %v2271_v15 = vpack.i.bf16 %v3015_v7, %v2994_v37  ;;  %v1448_v62 = vld [vmem:[%s3174_s1 + $0x98] sm:$0xff] }
 0x3e4   : > { %1997 = vmatprep.mubr.msk.f32.mxu1 %vm1325_vm6, %v1270_v35  ;;  %v1446_v35 = vld [vmem:[%s3174_s1 + $0x88] sm:$0xff]  ;;  %v2371_v17 = vmov 0.0|0.0   ;;  %v2276_v37 = vpack.i.bf16 %v3026_v8, %v3010_v6  ;;  %v2281_v36 = vpack.i.bf16 %v3040_v0, %v3035_v11  ;;  %v1450_v7 = vld [vmem:[%s3174_s1 + $0xb8] sm:$0xff] }
 0x3e5   : > { %2267 = vrot.lane.b32.xlu0 %v2266_v14, %s2370_s4  ;;  %2272 = vrot.lane.b32.xlu1 %v2271_v15, %s2370_s4 }
 0x3e6   : > { %2105 = vmatprep.subr.bf16.mxu1 %v2371_v17 }
 0x3e9   : > { %1600 = vrot.lane.b32.xlu0 %v2925_v22, %s2363_s14  ;;  %1602 = vrot.lane.b32.xlu1 %v1446_v35, %s2363_s14  ;;  %v1449_v22 = vld [vmem:[%s3174_s1 + $0xa8] sm:$0xff] }
 0x3ed   : > { %1604 = vrot.lane.b32.xlu0 %v2930_v52, %s2363_s14  ;;  %1606 = vrot.lane.b32.xlu1 %v1448_v62, %s2363_s14  ;;  %v2291_v52 = vpack.i.bf16 %v1450_v7, %v1449_v22 }
 0x3f1   : > { %2277 = vrot.lane.b32.xlu0 %v2276_v37, %s2370_s4  ;;  %2282 = vrot.lane.b32.xlu1 %v2281_v36, %s2370_s4 }
 0x3f2   : > { %v1256_v18 = vpop.permute.xlu0 %1255  ;;  %v1246_v10 = vpop.permute.xlu1 %1245 }
 0x3f3   : > { %v1271_v57 = vsel %vm1269_vm5, %v1266_v49, %v1256_v18  ;;  %v1267_v19 = vsel %vm1047_vm3, %v2973_v33, %v1246_v10  ;;  %v2286_v49 = vpack.i.bf16 %v1448_v62, %v1446_v35 }
 0x3f4   : > { %1998 = vmatmul.mubr.msk.f32.vlgmr.msra.gmra.mrb[0].mxu1 %vm1325_vm6, %v1271_v57 }
 0x3f5   : > { %2287 = vrot.lane.b32.xlu0 %v2286_v49, %s2370_s4  ;;  %2292 = vrot.lane.b32.xlu1 %v2291_v52, %s2370_s4  ;;  %s2303_s4 = scalar_lea.vmem %s2302_s3, 32 }
 0x3f9   : > { %1661 = vrot.lane.b32.xlu0 %v3045_v48, %s2363_s14  ;;  %s135_s14 = sand.u32 1, %s2351_s10  }
 0x3fa   : > { %s136_s23 = scalar_lea.vmem [#allocation2], %s135_s14  ;;  %s1740_s29 = scalar_lea.sflag [#allocation3], %s135_s14 }
 0x3fb   : > { %s1752_s24 = sshll.u32 %s136_s23, 4  ;;  %s3133_s24 = int_to_ptr.vmem [resolvable:$true] %s1752_s24 }
 0x3fc   : > { %s2297_s30 = scalar_lea.vmem %s3133_s24, 16  ;;  %p2304_p0 = scmp.lt.s32.totalorder %s3133_s24, %s2302_s3 }
 0x3fd   : > { %p2298_p11 = scmp.ne.s32.totalorder %s3133_s24, %s2297_s30  ;;  %p2305_p1 = scmp.lt.s32.totalorder %s2303_s4, %s2297_s30 }
 0x3fe   : > { %v1248_v61 = vpop.permute.xlu0 %1247  ;;  %v1258_v20 = vpop.permute.xlu1 %1257 }
 0x3ff   : > { %v1272_v27 = vsel %vm1269_vm5, %v1267_v19, %v1258_v20  ;;  %v1268_v24 = vsel %vm1047_vm3, %v1223_v45, %v1248_v61  ;;  %p2299_p12 = pnand %p2298_p11, %p2427_p5  ;;  %p2306_p2 = por %p2305_p1, %p2304_p0 }
 0x400   : > { %2000 = vmatprep.mubr.msk.f32.mxu1 %vm1325_vm6, %v1272_v27 }
 0x401   : > { %p2300_p13 = pneg %p2299_p12 }
 0x402   : > { %v1260_v2 = vpop.permute.xlu0 %1259  ;;  %v2228_v42 = vpop.permute.xlu1 %2227 }
 0x403   : > { %v1273_v25 = vsel %vm1269_vm5, %v1268_v24, %v1260_v2  ;;  %v2230_v29 = vunpack.i.h.bf16 %v2228_v42  ;;  %v2229_v5 = vunpack.i.l.bf16 %v2228_v42  ;;  %p2307_p3 = pnand %p2306_p2, %p2300_p13 }
 0x404   : > { %2001 = vmatmul.mubr.msk.f32.gmra.mrb[2].mxu1 %vm1325_vm6, %v1273_v25 }
 0x405   : > { %v1499_v33 = vsel %vm709_vm0, %v2229_v5, %v2230_v29  ;;  %2046 = vmatprep.mubr.msk.f32.mxu1 %vm2372_vm7, %v2365_v55 }
 0x406   : > { %v2233_v50 = vpop.permute.xlu0 %2232  ;;  %v2238_v26 = vpop.permute.xlu1 %2237 }
 0x407   : > { %v2235_v21 = vunpack.i.h.bf16 %v2233_v50  ;;  %v2234_v30 = vunpack.i.l.bf16 %v2233_v50  ;;  %v2240_v32 = vunpack.i.h.bf16 %v2238_v26  ;;  %v2239_v43 = vunpack.i.l.bf16 %v2238_v26 }
 0x409   : > { %v1500_v46 = vsel %vm709_vm0, %v2234_v30, %v2235_v21  ;;  %v1501_v44 = vsel %vm709_vm0, %v2239_v43, %v2240_v32 }
 0x40a   : > { %v2243_v31 = vpop.permute.xlu0 %2242  ;;  %v2248_v23 = vpop.permute.xlu1 %2247  ;;  %v2089_v41 = vpack.c.bf16 %v1500_v46, %v1499_v33 }
 0x40b   : > { %v2245_v34 = vunpack.i.h.bf16 %v2243_v31  ;;  %v2244_v47 = vunpack.i.l.bf16 %v2243_v31  ;;  %v2250_v39 = vunpack.i.h.bf16 %v2248_v23  ;;  %v2249_v40 = vunpack.i.l.bf16 %v2248_v23 }
 0x40c   : > { %2090 = vmatprep.subr.bf16.mxu0 %v2089_v41 }
 0x40d   : > { %v1502_v45 = vsel %vm709_vm0, %v2244_v47, %v2245_v34  ;;  %2092 = vmatpush3.bf16.msra.mxu0 %v2089_v41  ;;  %v1503_v12 = vsel %vm709_vm0, %v2249_v40, %v2250_v39 }
 0x40e   : > { %v2253_v3 = vpop.permute.xlu0 %2252  ;;  %v2093_v58 = vpack.c.bf16 %v1502_v45, %v1501_v44  ;;  %v3074_v59 = vpop.permute.xlu1 %1322 }
 0x40f   : > { %v2255_v51 = vunpack.i.h.bf16 %v2253_v3  ;;  %v2254_v53 = vunpack.i.l.bf16 %v2253_v3 }
 0x410   : > { %2094 = vmatprep.subr.bf16.mxu0 %v2093_v58 }
 0x411   : > { %v1504_v60 = vsel %vm709_vm0, %v2254_v53, %v2255_v51  ;;  %2096 = vmatpush3.bf16.msra.mxu0 %v2093_v58 }
 0x412   : > { %v2097_v63 = vpack.c.bf16 %v1504_v60, %v1503_v12  ;;  %v2258_v28 = vpop.permute.xlu0 %2257  ;;  %v2263_v4 = vpop.permute.xlu1 %2262 }
 0x413   : > { %v2260_v56 = vunpack.i.h.bf16 %v2258_v28  ;;  %v2259_v54 = vunpack.i.l.bf16 %v2258_v28  ;;  %v2265_v16 = vunpack.i.h.bf16 %v2263_v4  ;;  %v2264_v9 = vunpack.i.l.bf16 %v2263_v4 }
 0x414   : > { %2098 = vmatprep.subr.bf16.mxu0 %v2097_v63 }
 0x415   : > { %2100 = vmatpush3.bf16.msra.mxu0 %v2097_v63  ;;  %v1505_v1 = vsel %vm709_vm0, %v2259_v54, %v2260_v56  ;;  %v1506_v38 = vsel %vm709_vm0, %v2264_v9, %v2265_v16 }
 0x416   : > { %v2101_v13 = vpack.c.bf16 %v1506_v38, %v1505_v1 }
 0x418   : > { %2102 = vmatprep.subr.bf16.mxu0 %v2101_v13 }
 0x419   : > { %2104 = vmatpush3.bf16.msra.mxu0 %v2101_v13 }
 0x457   : > { %v2268_v19 = vpop.permute.xlu0 %2267  ;;  %v2273_v61 = vpop.permute.xlu1 %2272 }
 0x458   : > { %v2270_v20 = vunpack.i.h.bf16 %v2268_v19  ;;  %v2269_v27 = vunpack.i.l.bf16 %v2268_v19  ;;  %v2275_v24 = vunpack.i.h.bf16 %v2273_v61  ;;  %v2274_v2 = vunpack.i.l.bf16 %v2273_v61 }
 0x45a   : > { %v2106_v25 = vpack.c.bf16 %v2270_v20, %v2269_v27  ;;  %v2109_v29 = vpack.c.bf16 %v2275_v24, %v2274_v2 }
 0x45b   : > { %v1601_v48 = vpop.permute.xlu0 %1600  ;;  %v1603_v33 = vpop.permute.xlu1 %1602 }
 0x45c   : > { %2107 = vmatpush3.bf16.msra.mxu1 %v2106_v25  ;;  %v1608_v54 = vsel %vm709_vm0, %v1601_v48, %v1603_v33 }
 0x45d   : > { %2108 = vmatprep.subr.bf16.mxu1 %v2371_v17 }
 0x45f   : > { %v1605_v31 = vpop.permute.xlu0 %1604  ;;  %v1607_v46 = vpop.permute.xlu1 %1606 }
 0x460   : > { %2110 = vmatpush3.bf16.msra.mxu1 %v2109_v29  ;;  %v1609_v28 = vsel %vm709_vm0, %v1605_v31, %v1607_v46 }
 0x461   : > { %2111 = vmatprep.subr.bf16.mxu1 %v2371_v17 }
 0x463   : > { %v2278_v43 = vpop.permute.xlu0 %2277  ;;  %v2283_v39 = vpop.permute.xlu1 %2282 }
 0x464   : > { %v2280_v23 = vunpack.i.h.bf16 %v2278_v43  ;;  %v2279_v34 = vunpack.i.l.bf16 %v2278_v43  ;;  %v2285_v40 = vunpack.i.h.bf16 %v2283_v39  ;;  %v2284_v41 = vunpack.i.l.bf16 %v2283_v39 }
 0x466   : > { %v2112_v47 = vpack.c.bf16 %v2280_v23, %v2279_v34  ;;  %v2115_v3 = vpack.c.bf16 %v2285_v40, %v2284_v41 }
 0x467   : > { %v2288_v44 = vpop.permute.xlu0 %2287  ;;  %v2293_v58 = vpop.permute.xlu1 %2292 }
 0x468   : > { %2113 = vmatpush3.bf16.msra.mxu1 %v2112_v47  ;;  %v2290_v45 = vunpack.i.h.bf16 %v2288_v44  ;;  %v2289_v51 = vunpack.i.l.bf16 %v2288_v44  ;;  %v2294_v12 = vunpack.i.l.bf16 %v2293_v58 }
 0x469   : > { %2114 = vmatprep.subr.bf16.mxu1 %v2371_v17 }
 0x46a   : > { %v2118_v53 = vpack.c.bf16 %v2290_v45, %v2289_v51 }
 0x46b   : > { %v1662_v62 = vpop.permute.xlu0 %1661 }
 0x46c   : > { %2116 = vmatpush3.bf16.msra.mxu1 %v2115_v3 }
 0x46d   : > { %2117 = vmatprep.subr.bf16.mxu1 %v2371_v17 }
 0x470   : > { %2119 = vmatpush3.bf16.msra.mxu1 %v2118_v53 }
 0x471   : > { %2120 = vmatprep.subr.bf16.mxu1 %v2371_v17 }
 0x4c7   : > { %v1999_v6 = vpop.f32.mrb[0].mxu1 }
 0x4c8   : > { %v1410_v8 = vadd.f32 %v1999_v6, %v3074_v59  ;;  %v1404_v11 = vpop.f32.mrb[1].mxu1 }
 0x4c9   : > { %v1405_v0 = vadd.f32 %v1404_v11, %v3074_v59 }
 0x4ca   : > { %v1424_v18 = vmax.f32 %v1410_v8, 0.0 }
 0x4cb   : > { %v1423_v57 = vmax.f32 %v1405_v0, 0.0 }
 0x4cd   : > { %v1427_v10 = vmax.f32 %v1423_v57, %v1424_v18 }
 0x4cf   : > { %2019 = vmatprep.mubr.msk.f32.mxu0 %vm1269_vm5, %v1427_v10 }
 0x4d7   : > { %v2002_v42 = vpop.f32.mrb[2].mxu1 }
 0x4d8   : > { %v1420_v50 = vadd.f32 %v2002_v42, %v3074_v59  ;;  %v1414_v26 = vpop.f32.mrb[3].mxu1 }
 0x4d9   : > { %v1415_v5 = vadd.f32 %v1414_v26, %v3074_v59  ;;  %v2295_v59 = vunpack.i.h.bf16 %v2293_v58 }
 0x4da   : > { %v1426_v21 = vmax.f32 %v1420_v50, 0.0 }
 0x4db   : > { %v1425_v30 = vmax.f32 %v1415_v5, 0.0  ;;  %v2121_v60 = vpack.c.bf16 %v2295_v59, %v2294_v12 }
 0x4dd   : > { %v1428_v32 = vmax.f32 %v1425_v30, %v1426_v21  ;;  %2122 = vmatpush3.bf16.msra.mxu1 %v2121_v60 }
 0x4df   : > { %2020 = vmatmul.mubr.msk.f32.vlgmr.msra.gmra.mrb[24].mxu0 %vm1269_vm5, %v1428_v32 }
 0x5b2   : > { %v2021_v63 = vpop.f32.mrb[24].mxu0 }
 0x5b3   : > { %v1613_v4 = vmul.f32 %v2021_v63, %v1609_v28  ;;  %v1587_v56 = vpop.f32.mrb[25].mxu0 }
 0x5b4   : > { %v1612_v16 = vmul.f32 %v1608_v54, %v1587_v56 }
 0x5b5   : > { %v1615_v9 = vsel %vm1325_vm6, %v1613_v4, 0.0 }
 0x5b6   : > { %v1614_v1 = vsel %vm1325_vm6, %v1612_v16, 0.0 }
 0x5b7   : > { %v1616_v38 = vadd.f32 %v1615_v9, %v1614_v1 }
 0x5b9   : > { %v1617_v13 = vrot.slane %v1616_v38, 4 }
 0x5bb   : > { %v1618_v14 = vadd.f32 %v1617_v13, %v1616_v38 }
 0x5bd   : > { %v1619_v15 = vrot.slane %v1618_v14, 2 }
 0x5bf   : > { %v1620_v55 = vadd.f32 %v1619_v15, %v1618_v14 }
 0x5c1   : > { %v1621_v35 = vrot.slane %v1620_v55, 1 }
 0x5c3   : > { %v1622_v17 = vadd.f32 %v1621_v35, %v1620_v55 }
 0x5c5   : > { %2047 = vmatmul.mubr.msk.f32.vlgmr.msra.gmra.mrb[4].mxu1 %vm1325_vm6, %v1622_v17 }
 0x698   : > { %v1733_v37 = vpop.f32.mrb[4].mxu1 }
 0x699   : > { %v1734_v36 = vadd.f32 %v1733_v37, %v1662_v62  ;;  %v2048_v22 = vpop.f32.mrb[5].mxu1 }
 0x69b   : > { %1738 = vst.msk [vmem:[%s136_s23] sm:$0x1] %vm1737_vm8, %v1734_v36 }
 0x69c   : > { %2310 = shalt.err (!%p2307_p3)
}
 0x69d   : > { %s2311_s5 = scalar_lea.hbm %s3131_s28, 16  ;;  %s2315_s8 = scalar_lea.hbm %s3175_s2, 32 }
 0x69e   : > { %p2312_p4 = scmp.ne.s32.totalorder %s3131_s28, %s2311_s5  ;;  %p2316_p9 = scmp.lt.u32.totalorder %s3131_s28, %s3175_s2 }
 0x69f   : > { %p2317_p10 = scmp.lt.u32.totalorder %s2315_s8, %s2311_s5  ;;  %p2319_p12 = scmp.lt.u32.totalorder %s2311_s5, %s3131_s28 }
 0x6a0   : > { %p2313_p7 = pnand %p2312_p4, %p2427_p5 }
 0x6a1   : > { %p2318_p11 = por %p2317_p10, %p2316_p9 }
 0x6a2   : > { %p2314_p8 = pneg %p2313_p7 }
 0x6a3   : > { %p2320_p13 = por %p2319_p12, %p2318_p11 }
 0x6a5   : > { %p2321_p0 = pnand %p2320_p13, %p2314_p8 }
 0x6a7   : > { %2324 = shalt.err (!%p2321_p0)
}
 0x6a8   : > { %2123 = dma.vmem_to_hbm [thread:$0]  (%p2427_p5), %s3133_s24, 16, %s3131_s28, %s1740_s29  }
 0x6a9 PF: > { %p2129_p1 = scmp.ge.s32.totalorder %s2359_s12, 2  ;;  %s1764_s17 = sand.u32 1, %s2347_s9  }
 0x6aa   : > { %s1765_s21 = scalar_lea.sflag [#allocation3], %s1764_s17 }
 0x6ab   : > { %p2126_p2 = pnand %p2129_p1, %p2431_p6 }
 0x6ad   : > { %2342 = dma.done.wait (!%p2126_p2), %s1765_s21, 16  }
 0x6ae   : > { %2344 = vsyncadd (!%p2126_p2), %s1765_s21, 4294967280  ;;  %p12_p3 = scmp.ge.s32.totalorder %s2414_s15, 4   ;;  %s3178_s9 = smov %s2351_s10 }
 0x6af   : > { %s3179_s10 = smov %s2355_s11  ;;  %s3180_s11 = smov %s2425_s18 }
 0x6b0   : > { %s3181_s12 = smov %s2414_s15  ;;  %14 = sbr.rel (!%p12_p3) target bundleno = 3 (0x3), region = 63 }
 0x6b7   :  { %1769 = vsyncpa [#allocation3], 1 }
 0x6b8   :  { %1771 = vsyncpa [#allocation3 + $0x1], 1 }

</bundles_post_ra>
